<compile_context>
chip_gen: v6e
topology: v6e:2x2x1
jax: 0.10.0
libtpu: 0.0.40
codegen_flags: <defaults>
</compile_context>

<pallas_src>
import jax
import jax.numpy as jnp
from jax.experimental import pallas as pl
from jax.experimental.pallas import tpu as pltpu

OBS_DIM = 7
H1 = 512
H2 = 384
OUT_DIM = 1


def _round_up(x, m):
    return ((x + m - 1) // m) * m


def actor_kernel(x_ref, w1_ref, b1_ref, w2_ref, b2_ref, w3_ref, b3_ref, out_ref):
    # ---- fc1 + ReLU: MXU, bf16 operands, f32 accumulation (Mosaic pads K=7) ----
    x = x_ref[...].astype(jnp.bfloat16)                       # (TB, 7)   bf16
    h1 = jnp.dot(x, w1_ref[...], preferred_element_type=jnp.float32)
    h1 = jnp.maximum(h1 + b1_ref[...], 0.0).astype(jnp.bfloat16)   # (TB, 512) bf16

    # ---- fc2 + ReLU: MXU, bf16 x bf16 -> f32 accumulation ----------------------
    h2 = jnp.dot(h1, w2_ref[...], preferred_element_type=jnp.float32)
    h2 = jnp.maximum(h2 + b2_ref[...], 0.0)                   # (TB, 384) f32

    # ---- fc3 + Tanh: N=1 -> VPU multiply + XLU lane reduction (f32 weights) ----
    h3 = jnp.sum(h2 * w3_ref[...], axis=-1, keepdims=True) + b3_ref[...]
    out_ref[...] = jnp.tanh(h3)                               # (TB, 1)   f32


def actor_forward(obs, params, *, tb=1024):
    """obs: (B, 7) float32. Returns actions: (B, 1) float32."""
    w1, b1, w2, b2, w3, b3 = params
    B = obs.shape[0]

    # Tile-size selection:
    #  - default 1024 rows/tile amortizes the ~0.35 us/step grid overhead,
    #  - capped so the "parallel" batch axis has >= 2 grid steps (v7x has 2 TCs),
    #  - sublane-aligned (multiple of 8) whenever the tile is a true sub-block.
    if B <= 8:
        tb = B
    else:
        tb = min(tb, B)
        tb = min(tb, _round_up(pl.cdiv(B, 2), 8))
        tb = max(8, (tb // 8) * 8)
    grid = (pl.cdiv(B, tb),)

    flops = 2 * B * (OBS_DIM * H1 + H1 * H2 + H2 * OUT_DIM)
    bytes_accessed = (
        obs.size * obs.dtype.itemsize
        + sum(p.size * p.dtype.itemsize for p in params)
        + B * OUT_DIM * 4
    )

    return pl.pallas_call(
        actor_kernel,
        out_shape=jax.ShapeDtypeStruct((B, OUT_DIM), jnp.float32),
        grid=grid,
        in_specs=[
            # Activations: tiled over the batch grid (pipelined).
            pl.BlockSpec((tb, OBS_DIM), lambda i: (i, 0)),
            # Weights/biases: constant block index => fetched once, VMEM-resident.
            pl.BlockSpec((OBS_DIM, H1), lambda i: (0, 0)),
            pl.BlockSpec((1, H1),       lambda i: (0, 0)),
            pl.BlockSpec((H1, H2),      lambda i: (0, 0)),
            pl.BlockSpec((1, H2),       lambda i: (0, 0)),
            pl.BlockSpec((1, H2),       lambda i: (0, 0)),
            pl.BlockSpec((1, OUT_DIM),  lambda i: (0, 0)),
        ],
        out_specs=pl.BlockSpec((tb, OUT_DIM), lambda i: (i, 0)),
        compiler_params=pltpu.CompilerParams(
            dimension_semantics=("parallel",)),
        cost_estimate=pl.CostEstimate(
            flops=flops, transcendentals=B, bytes_accessed=bytes_accessed),
    )(obs, w1, b1, w2, b2, w3, b3)


def init_actor_params(key):
    """PyTorch nn.Linear default init: U(-1/sqrt(fan_in), 1/sqrt(fan_in)).
    w1, w2 stored pre-transposed as (in, out) in bf16 (MXU-native; kernel
    accumulates in f32). w3 kept as a (1, 384) f32 row (PyTorch's (out, in)
    layout) for the lane-reduction fc3 path; biases stay f32."""
    shapes = [(OBS_DIM, H1), (H1, H2), (H2, OUT_DIM)]
    raw = []
    for fan_in, fan_out in shapes:
        key, kw, kb = jax.random.split(key, 3)
        bound = 1.0 / (fan_in ** 0.5)
        w = jax.random.uniform(kw, (fan_in, fan_out), jnp.float32, -bound, bound)
        b = jax.random.uniform(kb, (1, fan_out), jnp.float32, -bound, bound)
        raw.append((w, b))
    (w1, b1), (w2, b2), (w3, b3) = raw
    w1 = w1.astype(jnp.bfloat16)
    w2 = w2.astype(jnp.bfloat16)
    w3 = w3.reshape(1, H2)               # (384, 1) column -> (1, 384) f32 row
    return (w1, b1, w2, b2, w3, b3)


def actor_reference_fp32(obs, params):
    """Full-fp32 plain-JAX reference with the original module's semantics."""
    w1, b1, w2, b2, w3, b3 = params
    h1 = jnp.maximum(obs @ w1.astype(jnp.float32) + b1, 0.0)
    h2 = jnp.maximum(h1 @ w2.astype(jnp.float32) + b2, 0.0)
    return jnp.tanh(h2 @ w3.astype(jnp.float32).T + b3)


if __name__ == "__main__":
    key = jax.random.PRNGKey(0)
    key, kobs = jax.random.split(key)

    B = 256                              # small demo batch; tile logic -> tb=128, grid of 2
    obs = jax.random.normal(kobs, (B, OBS_DIM), dtype=jnp.float32)
    params = init_actor_params(key)

    actions = jax.block_until_ready(actor_forward(obs, params))

    ref = actor_reference_fp32(obs, params)
    assert actions.shape == (B, OUT_DIM)
    err = float(jnp.max(jnp.abs(actions - ref)))
    # bf16 fc1/fc2 weights + bf16 h1 => ~1e-3..1e-2 deviation from fp32 reference.
    assert err < 2e-2, f"mismatch: max abs err = {err}"
    print("KERNEL_OK")
</pallas_src>

<mosaic_0001>
module attributes {stable_mosaic.version = 11 : i64} {
  func.func @actor_kernel(%arg0: i32, %arg1: memref<128x7xf32, #tpu.memory_space<vmem>>, %arg2: memref<7x512xbf16, #tpu.memory_space<vmem>>, %arg3: memref<1x512xf32, #tpu.memory_space<vmem>>, %arg4: memref<512x384xbf16, #tpu.memory_space<vmem>>, %arg5: memref<1x384xf32, #tpu.memory_space<vmem>>, %arg6: memref<1x384xf32, #tpu.memory_space<vmem>>, %arg7: memref<1x1xf32, #tpu.memory_space<vmem>>, %arg8: memref<128x1xf32, #tpu.memory_space<vmem>>) attributes {dimension_semantics = [#tpu.dimension_semantics<parallel>], iteration_bounds = array<i64: 2>, scalar_prefetch = 0 : i64, scratch_operands = 0 : i64, tpu.core_type = #tpu.core_type<tc>, window_params = [{transform_indices = @transform_0, window_bounds = array<i64: 128, 7>}, {pipeline_mode = #tpu.pipeline_mode<synchronous>, transform_indices = @transform_1, window_bounds = array<i64: 7, 512>}, {pipeline_mode = #tpu.pipeline_mode<synchronous>, transform_indices = @transform_2, window_bounds = array<i64: 1, 512>}, {pipeline_mode = #tpu.pipeline_mode<synchronous>, transform_indices = @transform_3, window_bounds = array<i64: 512, 384>}, {pipeline_mode = #tpu.pipeline_mode<synchronous>, transform_indices = @transform_4, window_bounds = array<i64: 1, 384>}, {pipeline_mode = #tpu.pipeline_mode<synchronous>, transform_indices = @transform_5, window_bounds = array<i64: 1, 384>}, {pipeline_mode = #tpu.pipeline_mode<synchronous>, transform_indices = @transform_6, window_bounds = array<i64: 1, 1>}, {transform_indices = @transform_7, window_bounds = array<i64: 128, 1>}]} {
    %c0 = arith.constant 0 : index
    %c0_0 = arith.constant 0 : index
    %0 = vector.load %arg1[%c0, %c0_0] : memref<128x7xf32, #tpu.memory_space<vmem>>, vector<128x7xf32>
    %1 = arith.truncf %0 : vector<128x7xf32> to vector<128x7xbf16>
    %c0_1 = arith.constant 0 : index
    %c0_2 = arith.constant 0 : index
    %2 = vector.load %arg2[%c0_1, %c0_2] : memref<7x512xbf16, #tpu.memory_space<vmem>>, vector<7x512xbf16>
    %cst = arith.constant dense<0.000000e+00> : vector<128x512xf32>
    %3 = tpu.matmul %1, %2, %cst {dimension_numbers = #tpu.dot_dimension_numbers<[1], [0], [0], [1], [0, 0, 1, 1], [], []>} : vector<128x7xbf16>, vector<7x512xbf16>, vector<128x512xf32> -> vector<128x512xf32>
    %c0_3 = arith.constant 0 : index
    %c0_4 = arith.constant 0 : index
    %4 = vector.load %arg3[%c0_3, %c0_4] : memref<1x512xf32, #tpu.memory_space<vmem>>, vector<1x512xf32>
    %5 = vector.broadcast %4 : vector<1x512xf32> to vector<128x512xf32>
    %6 = arith.addf %3, %5 : vector<128x512xf32>
    %cst_5 = arith.constant 0.000000e+00 : f32
    %7 = vector.broadcast %cst_5 : f32 to vector<128x512xf32>
    %8 = arith.maximumf %6, %7 : vector<128x512xf32>
    %9 = arith.truncf %8 : vector<128x512xf32> to vector<128x512xbf16>
    %c0_6 = arith.constant 0 : index
    %c0_7 = arith.constant 0 : index
    %10 = vector.load %arg4[%c0_6, %c0_7] : memref<512x384xbf16, #tpu.memory_space<vmem>>, vector<512x384xbf16>
    %cst_8 = arith.constant dense<0.000000e+00> : vector<128x384xf32>
    %11 = tpu.matmul %9, %10, %cst_8 {dimension_numbers = #tpu.dot_dimension_numbers<[1], [0], [0], [1], [0, 0, 1, 1], [], []>} : vector<128x512xbf16>, vector<512x384xbf16>, vector<128x384xf32> -> vector<128x384xf32>
    %c0_9 = arith.constant 0 : index
    %c0_10 = arith.constant 0 : index
    %12 = vector.load %arg5[%c0_9, %c0_10] : memref<1x384xf32, #tpu.memory_space<vmem>>, vector<1x384xf32>
    %13 = vector.broadcast %12 : vector<1x384xf32> to vector<128x384xf32>
    %14 = arith.addf %11, %13 : vector<128x384xf32>
    %cst_11 = arith.constant 0.000000e+00 : f32
    %15 = vector.broadcast %cst_11 : f32 to vector<128x384xf32>
    %16 = arith.maximumf %14, %15 : vector<128x384xf32>
    %c0_12 = arith.constant 0 : index
    %c0_13 = arith.constant 0 : index
    %17 = vector.load %arg6[%c0_12, %c0_13] : memref<1x384xf32, #tpu.memory_space<vmem>>, vector<1x384xf32>
    %18 = vector.broadcast %17 : vector<1x384xf32> to vector<128x384xf32>
    %19 = arith.mulf %16, %18 : vector<128x384xf32>
    %cst_14 = arith.constant dense<0.000000e+00> : vector<128xf32>
    %20 = vector.multi_reduction <add>, %19, %cst_14 [1] : vector<128x384xf32> to vector<128xf32>
    %21 = vector.shape_cast %20 : vector<128xf32> to vector<128x1xf32>
    %c0_15 = arith.constant 0 : index
    %c0_16 = arith.constant 0 : index
    %22 = vector.load %arg7[%c0_15, %c0_16] : memref<1x1xf32, #tpu.memory_space<vmem>>, vector<1x1xf32>
    %23 = vector.broadcast %22 : vector<1x1xf32> to vector<128x1xf32>
    %24 = arith.addf %21, %23 : vector<128x1xf32>
    %25 = math.tanh %24 : vector<128x1xf32>
    %c0_17 = arith.constant 0 : index
    %c0_18 = arith.constant 0 : index
    %26 = vector.load %arg8[%c0_17, %c0_18] : memref<128x1xf32, #tpu.memory_space<vmem>>, vector<128x1xf32>
    tpu.vector_store %arg8[%c0_17, %c0_18], %25 {strides = array<i32>} : memref<128x1xf32, #tpu.memory_space<vmem>>, vector<128x1xf32>,
    return
  }
  func.func @transform_0(%arg0: i32) -> (i32, i32) {
    %c0_i32 = arith.constant 0 : i32
    %c0_i32_0 = arith.constant 0 : i32
    return %arg0, %c0_i32 : i32, i32
  }
  func.func @transform_1(%arg0: i32) -> (i32, i32) {
    %c0_i32 = arith.constant 0 : i32
    %c0_i32_0 = arith.constant 0 : i32
    %c0_i32_1 = arith.constant 0 : i32
    return %c0_i32, %c0_i32_0 : i32, i32
  }
  func.func @transform_2(%arg0: i32) -> (i32, i32) {
    %c0_i32 = arith.constant 0 : i32
    %c0_i32_0 = arith.constant 0 : i32
    %c0_i32_1 = arith.constant 0 : i32
    return %c0_i32, %c0_i32_0 : i32, i32
  }
  func.func @transform_3(%arg0: i32) -> (i32, i32) {
    %c0_i32 = arith.constant 0 : i32
    %c0_i32_0 = arith.constant 0 : i32
    %c0_i32_1 = arith.constant 0 : i32
    return %c0_i32, %c0_i32_0 : i32, i32
  }
  func.func @transform_4(%arg0: i32) -> (i32, i32) {
    %c0_i32 = arith.constant 0 : i32
    %c0_i32_0 = arith.constant 0 : i32
    %c0_i32_1 = arith.constant 0 : i32
    return %c0_i32, %c0_i32_0 : i32, i32
  }
  func.func @transform_5(%arg0: i32) -> (i32, i32) {
    %c0_i32 = arith.constant 0 : i32
    %c0_i32_0 = arith.constant 0 : i32
    %c0_i32_1 = arith.constant 0 : i32
    return %c0_i32, %c0_i32_0 : i32, i32
  }
  func.func @transform_6(%arg0: i32) -> (i32, i32) {
    %c0_i32 = arith.constant 0 : i32
    %c0_i32_0 = arith.constant 0 : i32
    %c0_i32_1 = arith.constant 0 : i32
    return %c0_i32, %c0_i32_0 : i32, i32
  }
  func.func @transform_7(%arg0: i32) -> (i32, i32) {
    %c0_i32 = arith.constant 0 : i32
    %c0_i32_0 = arith.constant 0 : i32
    return %arg0, %c0_i32 : i32, i32
  }
}

</mosaic_0001>

<bundles_post_ra>
// kernel: tpu_custom_call.1
= control target key start
LH: loop header
LB: loop body
LE: loop exit
PB: predicated region body
PF: predicated region fallthrough
CT: control target
= control target key end

     0   :  { %s3141_s0 = inlined_call_operand.vmem [shape: f32[256,7], index: 0, kind: input, shape index: {}]   ;;  %s3142_s1 = inlined_call_operand.vmem [shape: bf16[7,512], index: 1, kind: input, shape index: {}]   ;;  %s3143_s2 = inlined_call_operand.vmem [shape: f32[1,512], index: 2, kind: input, shape index: {}]   ;;  %s3144_s3 = inlined_call_operand.hbm [shape: bf16[512,384], index: 3, kind: input, shape index: {}]   ;;  %s3145_s4 = inlined_call_operand.vmem [shape: f32[1,384], index: 4, kind: input, shape index: {}]   ;;  %s3146_s5 = inlined_call_operand.vmem [shape: f32[1,384], index: 5, kind: input, shape index: {}]   ;;  %s3147_s6 = inlined_call_operand.<no memory space> [shape: f32[1,1], index: 6, kind: input, shape index: {}]   ;;  %s3148_s7 = inlined_call_operand.vmem [shape: f32[256,1], index: 7, kind: output, shape index: {}]  }
   0x1   :  { %v12_v0 = vstv %s3147_s6 }
   0x2   :  { %13 = vst [vmem:[#allocation2] sm:$0x1] %v12_v0 }
   0x3   :  { %14 = vsyncpa [#allocation4], 0  ;;  %s2630_s26 = smov 0  }
   0x4 LB: > { %s2099_s27 = sadd.s32 4294967295, %s2580_s26   ;;  %p2101_p0 = scmp.ge.s32.totalorder %s2580_s26, 1  ;;  %s2580_s26 = sphi %s2630_s26, %s20_s26  }
   0x5   : > { %p203_p1 = scmp.lt.s32.totalorder %s2580_s26, 3  ;;  %s2582_s28 = smov [#allocation3]  }
   0x6   : > { %s221_s29 = sshll.u32 %s2582_s28, 4  ;;  %p2642_p3 = scmp.eq.s32.totalorder %s2099_s27, 0  ;;  %s222_s29 = int_to_ptr.vmem [resolvable:$true] %s221_s29 }
   0x7   : > { %p2638_p2 = pnand %p2101_p0, %p203_p1  ;;  %s2555_s8 = scalar_lea.vmem %s222_s29, 12288 }
   0x8   : > { %p2556_p7 = scmp.ne.s32.totalorder %s222_s29, %s2555_s8  ;;  %p2563_p10 = scmp.lt.s32.totalorder %s222_s29, %s222_s29 }
   0x9   : > { %p2361_p4 = pneg %p2638_p2  ;;  %p2564_p11 = scmp.lt.s32.totalorder %s2555_s8, %s2555_s8 }
   0xb   : > { %p2362_p5 = pnand %p2642_p3, %p2361_p4  ;;  %p2565_p12 = por %p2564_p11, %p2563_p10 }
   0xd   : > { %p2546_p6 = pneg %p2362_p5 }
   0xf   : > { %p2558_p8 = pnand %p2556_p7, %p2546_p6 }
  0x11   : > { %p2559_p9 = pneg %p2558_p8 }
  0x13   : > { %p2566_p13 = pnand %p2565_p12, %p2559_p9 }
  0x15   : > { %2569 = shalt.err (!%p2566_p13)
}
  0x16   : > { %s2583_s9 = smov 192   ;;  %s2584_s10 = smov 12  }
  0x17   : > { %2364 = dma.hbm_to_vmem [thread:$0]  (!%p2362_p5), %s3144_s3, 12288, %s222_s29, [#allocation4], %s2583_s9, %s2583_s9, %s2584_s10  }
  0x18   : > { %255 = sbr.rel (%p2638_p2) target bundleno = 732 (0x2dc), region = 48 }
  0x1d   : > { %2575 = dma.done.wait (%p2642_p3), [#allocation4], 12288  }
  0x1e   : > { %2577 = vsyncadd (%p2642_p3), [#allocation4], 4294955008  ;;  %vm383_vm0 = vcmask 1042432   ;;  %v2585_v1 = vmov 0   ;;  %s2106_s13 = sshll.u32 %s2099_s27, 4  ;;  %vm384_vm1 = vcmask 1043456  }
  0x1f   : > { %431 = vmatprep.mubr.bf16.mxu0 %v2585_v1  ;;  %544 = vmatprep.mubr.bf16.mxu1 %v2585_v1  ;;  %p288_p0 = scmp.lt.s32.totalorder %s2106_s13, 31  ;;  %v2586_v2 = vmov 65535   ;;  %v324_v4 = vld [vmem:[%s3142_s1] sm:$0xff]  ;;  %v325_v6 = vld [vmem:[%s3142_s1 + $0x8] sm:$0xff]  ;;  %vm358_vm2 = vcmask 56320   ;;  %vm2014_vm3 = vcmask 7168  }
  0x20   : > { %v385_v3 = vsel %vm383_vm0, 4294967295, %v2586_v2  ;;  %v2111_v7 = vcombine.high %v324_v4, %v324_v4  ;;  %v2113_v8 = vcombine.high %v325_v6, %v325_v6  ;;  %v2110_v9 = vcombine.low %v324_v4, %v324_v4  ;;  %v2384_v18 = vld [vmem:[#allocation3 + $0xa8] ss:$12 sps:$4 sm:$0xff]   ;;  %v2386_v19 = vld [vmem:[#allocation3 + $0xac] ss:$12 sps:$4 sm:$0xff]  }
  0x21   : > { %s3152_s13 = smov (!%p288_p0, %s2106_s13), 31  ;;  %v386_v5 = vsel %vm384_vm1, %v385_v3, 0  ;;  %v2112_v10 = vcombine.low %v325_v6, %v325_v6  ;;  %v2387_v20 = vld [vmem:[#allocation3 + $0x228] ss:$12 sps:$4 sm:$0xff]   ;;  %v2389_v21 = vld [vmem:[#allocation3 + $0x22c] ss:$12 sps:$4 sm:$0xff]  }
  0x22   : > { %s2107_s14 = sshll.u32 %s3152_s13, 3  ;;  %v391_v13 = vand.u32 %v2111_v7, %v386_v5  ;;  %v397_v14 = vand.u32 %v2113_v8, %v386_v5  ;;  %v388_v15 = vand.u32 %v2110_v9, %v386_v5  ;;  %v2392_v23 = vld [vmem:[#allocation3 + $0x94] ss:$12 sps:$4 sm:$0xff]   ;;  %v2390_v26 = vld [vmem:[#allocation3 + $0x90] ss:$12 sps:$4 sm:$0xff]  }
  0x23   : > { %s2675_s21 = scalar_lea.vmem %s3141_s0, %s2107_s14  ;;  %v394_v16 = vand.u32 %v2112_v10, %v386_v5  ;;  %v2395_v25 = vld [vmem:[#allocation3 + $0x214] ss:$12 sps:$4 sm:$0xff]   ;;  %v2393_v27 = vld [vmem:[#allocation3 + $0x210] ss:$12 sps:$4 sm:$0xff]   ;;  %v2396_v32 = vld [vmem:[#allocation3 + $0x78] ss:$12 sps:$4 sm:$0xff]   ;;  %s3092_s6 = scalar_lea.vmem %s3148_s7, %s2107_s14 }
  0x24   : > { %v300_v11 = vld [vmem:[%s2675_s21] sm:$0xff]  ;;  %v301_v12 = vld [vmem:[%s2675_s21 + $0x8] sm:$0xff]  ;;  %413 = vmatprep.subr.bf16.mxu0 %v391_v13  ;;  %526 = vmatprep.subr.bf16.mxu1 %v397_v14  ;;  %v302_v22 = vld [vmem:[%s2675_s21 + $0x10] sm:$0xff] }
  0x25   : > { %v316_v17 = vpack.c.bf16 %v301_v12, %v300_v11  ;;  %414 = vmatpush1.bf16.msra.mxu0 %v388_v15  ;;  %527 = vmatpush1.bf16.msra.mxu1 %v394_v16  ;;  %v303_v24 = vld [vmem:[%s2675_s21 + $0x18] sm:$0xff]  ;;  %v304_v31 = vld [vmem:[%s2675_s21 + $0x20] sm:$0xff]  ;;  %v305_v36 = vld [vmem:[%s2675_s21 + $0x28] sm:$0xff] }
  0x26   : > { %1378 = vmatprep.subr.bf16.mxu0 %v2386_v19  ;;  %1491 = vmatprep.subr.bf16.mxu1 %v2389_v21  ;;  %v317_v28 = vpack.c.bf16 %v303_v24, %v302_v22  ;;  %v2398_v29 = vld [vmem:[#allocation3 + $0x7c] ss:$12 sps:$4 sm:$0xff]   ;;  %v2399_v33 = vld [vmem:[#allocation3 + $0x1f8] ss:$12 sps:$4 sm:$0xff]   ;;  %v2402_v37 = vld [vmem:[#allocation3 + $0x60] ss:$12 sps:$4 sm:$0xff]   ;;  %v318_v39 = vpack.c.bf16 %v305_v36, %v304_v31 }
  0x27   : > { %v2401_v30 = vld [vmem:[#allocation3 + $0x1fc] ss:$12 sps:$4 sm:$0xff]   ;;  %v2404_v34 = vld [vmem:[#allocation3 + $0x64] ss:$12 sps:$4 sm:$0xff]   ;;  %v2405_v38 = vld [vmem:[#allocation3 + $0x1e0] ss:$12 sps:$4 sm:$0xff]  }
  0x28   : > { %2114 = vmatmul.mubr.msk.bf16.vlgmr.msra.gmra.mxu0 %vm358_vm2, %v316_v17  ;;  %2122 = vmatmul.mubr.msk.bf16.vlgmr.msra.gmra.mxu1 %vm358_vm2, %v316_v17  ;;  %v2407_v35 = vld [vmem:[#allocation3 + $0x1e4] ss:$12 sps:$4 sm:$0xff]   ;;  %v2410_v40 = vld [vmem:[#allocation3 + $0x4c] ss:$12 sps:$4 sm:$0xff]   ;;  %v2408_v43 = vld [vmem:[#allocation3 + $0x48] ss:$12 sps:$4 sm:$0xff]  }
  0x29   : > { %441 = vmatprep.mubr.bf16.mxu0 %v2585_v1  ;;  %554 = vmatprep.mubr.bf16.mxu1 %v2585_v1  ;;  %v2413_v41 = vld [vmem:[#allocation3 + $0x1cc] ss:$12 sps:$4 sm:$0xff]   ;;  %v2411_v44 = vld [vmem:[#allocation3 + $0x1c8] ss:$12 sps:$4 sm:$0xff]   ;;  %v2414_v48 = vld [vmem:[#allocation3 + $0x30] ss:$12 sps:$4 sm:$0xff]  }
  0x2a   : > { %1379 = vmatpush1.bf16.msra.mxu0 %v2384_v18  ;;  %1492 = vmatpush1.bf16.msra.mxu1 %v2387_v20  ;;  %v306_v42 = vld [vmem:[%s2675_s21 + $0x30] sm:$0xff]  ;;  %v307_v47 = vld [vmem:[%s2675_s21 + $0x38] sm:$0xff]  ;;  %v308_v53 = vld [vmem:[%s2675_s21 + $0x40] sm:$0xff] }
  0x2b   : > { %1380 = vmatprep.subr.bf16.mxu0 %v2392_v23  ;;  %1493 = vmatprep.subr.bf16.mxu1 %v2395_v25  ;;  %v2416_v45 = vld [vmem:[#allocation3 + $0x34] ss:$12 sps:$4 sm:$0xff]   ;;  %v2417_v49 = vld [vmem:[#allocation3 + $0x1b0] ss:$12 sps:$4 sm:$0xff]   ;;  %v319_v50 = vpack.c.bf16 %v307_v47, %v306_v42  ;;  %v2420_v54 = vld [vmem:[#allocation3 + $0x18] ss:$12 sps:$4 sm:$0xff]  }
  0x2c   : > { %v2419_v46 = vld [vmem:[#allocation3 + $0x1b4] ss:$12 sps:$4 sm:$0xff]   ;;  %v2422_v51 = vld [vmem:[#allocation3 + $0x1c] ss:$12 sps:$4 sm:$0xff]   ;;  %v2423_v55 = vld [vmem:[#allocation3 + $0x198] ss:$12 sps:$4 sm:$0xff]  }
  0x2d   : > { %v2425_v52 = vld [vmem:[#allocation3 + $0x19c] ss:$12 sps:$4 sm:$0xff]   ;;  %v2428_v56 = vld [vmem:[#allocation3 + $0x4] ss:$12 sps:$4 sm:$0xff]   ;;  %v2426_v59 = vld [vmem:[#allocation3] ss:$12 sps:$4 sm:$0xff]  }
  0x2e   : > { %1381 = vmatpush1.bf16.msra.mxu0 %v2390_v26  ;;  %1494 = vmatpush1.bf16.msra.mxu1 %v2393_v27  ;;  %v2431_v57 = vld [vmem:[#allocation3 + $0x184] ss:$12 sps:$4 sm:$0xff]   ;;  %v2429_v60 = vld [vmem:[#allocation3 + $0x180] ss:$12 sps:$4 sm:$0xff]   ;;  %v2432_v62 = vld [vmem:[#allocation3 + $0x168] ss:$12 sps:$4 sm:$0xff]  }
  0x2f   : > { %1382 = vmatprep.subr.bf16.mxu0 %v2398_v29  ;;  %1495 = vmatprep.subr.bf16.mxu1 %v2401_v30  ;;  %v309_v58 = vld [vmem:[%s2675_s21 + $0x48] sm:$0xff]  ;;  %v310_v2 = vld [vmem:[%s2675_s21 + $0x50] sm:$0xff]  ;;  %v311_v3 = vld [vmem:[%s2675_s21 + $0x58] sm:$0xff] }
  0x30   : > { %2115 = vmatmul.mubr.msk.bf16.gmra.mxu0 %vm358_vm2, %v317_v28  ;;  %2123 = vmatmul.mubr.msk.bf16.gmra.mxu1 %vm358_vm2, %v317_v28  ;;  %v320_v61 = vpack.c.bf16 %v309_v58, %v308_v53  ;;  %v2434_v63 = vld [vmem:[#allocation3 + $0x16c] ss:$12 sps:$4 sm:$0xff]   ;;  %v2435_v4 = vld [vmem:[#allocation3 + $0x2e8] ss:$12 sps:$4 sm:$0xff]   ;;  %v2438_v7 = vld [vmem:[#allocation3 + $0x150] ss:$12 sps:$4 sm:$0xff]   ;;  %v321_v9 = vpack.c.bf16 %v311_v3, %v310_v2 }
  0x31   : > { %451 = vmatprep.mubr.bf16.mxu0 %v2585_v1  ;;  %564 = vmatprep.mubr.bf16.mxu1 %v2585_v1  ;;  %v2437_v0 = vld [vmem:[#allocation3 + $0x2ec] ss:$12 sps:$4 sm:$0xff]   ;;  %v2440_v5 = vld [vmem:[#allocation3 + $0x154] ss:$12 sps:$4 sm:$0xff]   ;;  %v2441_v8 = vld [vmem:[#allocation3 + $0x2d0] ss:$12 sps:$4 sm:$0xff]  }
  0x32   : > { %1383 = vmatpush1.bf16.msra.mxu0 %v2396_v32  ;;  %1496 = vmatpush1.bf16.msra.mxu1 %v2399_v33  ;;  %v2443_v6 = vld [vmem:[#allocation3 + $0x2d4] ss:$12 sps:$4 sm:$0xff]   ;;  %v2446_v10 = vld [vmem:[#allocation3 + $0x13c] ss:$12 sps:$4 sm:$0xff]   ;;  %v2444_v12 = vld [vmem:[#allocation3 + $0x138] ss:$12 sps:$4 sm:$0xff]  }
  0x33   : > { %1384 = vmatprep.subr.bf16.mxu0 %v2404_v34  ;;  %1497 = vmatprep.subr.bf16.mxu1 %v2407_v35  ;;  %v2449_v11 = vld [vmem:[#allocation3 + $0x2bc] ss:$12 sps:$4 sm:$0xff]   ;;  %v2447_v13 = vld [vmem:[#allocation3 + $0x2b8] ss:$12 sps:$4 sm:$0xff]   ;;  %v2450_v18 = vld [vmem:[#allocation3 + $0x120] ss:$12 sps:$4 sm:$0xff]  }
  0x34   : > { %v2452_v14 = vld [vmem:[#allocation3 + $0x124] ss:$12 sps:$4 sm:$0xff]   ;;  %v2453_v19 = vld [vmem:[#allocation3 + $0x2a0] ss:$12 sps:$4 sm:$0xff]   ;;  %v2456_v23 = vld [vmem:[#allocation3 + $0x108] ss:$12 sps:$4 sm:$0xff]  }
  0x35   : > { %v2455_v15 = vld [vmem:[#allocation3 + $0x2a4] ss:$12 sps:$4 sm:$0xff]   ;;  %v2458_v21 = vld [vmem:[#allocation3 + $0x10c] ss:$12 sps:$4 sm:$0xff]   ;;  %v2459_v24 = vld [vmem:[#allocation3 + $0x288] ss:$12 sps:$4 sm:$0xff]  }
  0x36   : > { %1385 = vmatpush1.bf16.msra.mxu0 %v2402_v37  ;;  %1498 = vmatpush1.bf16.msra.mxu1 %v2405_v38  ;;  %v312_v16 = vld [vmem:[%s2675_s21 + $0x60] sm:$0xff]  ;;  %v313_v17 = vld [vmem:[%s2675_s21 + $0x68] sm:$0xff]  ;;  %v314_v25 = vld [vmem:[%s2675_s21 + $0x70] sm:$0xff] }
  0x37   : > { %1386 = vmatprep.subr.bf16.mxu0 %v2410_v40  ;;  %1499 = vmatprep.subr.bf16.mxu1 %v2413_v41  ;;  %v322_v20 = vpack.c.bf16 %v313_v17, %v312_v16  ;;  %v2461_v22 = vld [vmem:[#allocation3 + $0x28c] ss:$12 sps:$4 sm:$0xff]   ;;  %v2464_v28 = vld [vmem:[#allocation3 + $0xf4] ss:$12 sps:$4 sm:$0xff]   ;;  %v2462_v30 = vld [vmem:[#allocation3 + $0xf0] ss:$12 sps:$4 sm:$0xff]   ;;  %v328_v41 = vlaneseq }
  0x38   : > { %2116 = vmatmul.mubr.msk.bf16.gmra.mxu0 %vm358_vm2, %v318_v39  ;;  %2124 = vmatmul.mubr.msk.bf16.gmra.mxu1 %vm358_vm2, %v318_v39  ;;  %v315_v26 = vld [vmem:[%s2675_s21 + $0x78] sm:$0xff]  ;;  %v2476_v35 = vld [vmem:[#allocation3 + $0xc4] ss:$12 sps:$4 sm:$0xff]   ;;  %v2474_v37 = vld [vmem:[#allocation3 + $0xc0] ss:$12 sps:$4 sm:$0xff]  }
  0x39   : > { %461 = vmatprep.mubr.bf16.mxu0 %v2585_v1  ;;  %574 = vmatprep.mubr.bf16.mxu1 %v2585_v1  ;;  %v323_v27 = vpack.c.bf16 %v315_v26, %v314_v25  ;;  %v2467_v29 = vld [vmem:[#allocation3 + $0x274] ss:$12 sps:$4 sm:$0xff]   ;;  %v2465_v31 = vld [vmem:[#allocation3 + $0x270] ss:$12 sps:$4 sm:$0xff]   ;;  %v2471_v34 = vld [vmem:[#allocation3 + $0x258] ss:$12 sps:$4 sm:$0xff]  }
  0x3a   : > { %1387 = vmatpush1.bf16.msra.mxu0 %v2408_v43  ;;  %1500 = vmatpush1.bf16.msra.mxu1 %v2411_v44  ;;  %v2470_v32 = vld [vmem:[#allocation3 + $0xdc] ss:$12 sps:$4 sm:$0xff]   ;;  %v2479_v36 = vld [vmem:[#allocation3 + $0x244] ss:$12 sps:$4 sm:$0xff]   ;;  %v2477_v38 = vld [vmem:[#allocation3 + $0x240] ss:$12 sps:$4 sm:$0xff]  }
  0x3b   : > { %1388 = vmatprep.subr.bf16.mxu0 %v2416_v45  ;;  %1501 = vmatprep.subr.bf16.mxu1 %v2419_v46  ;;  %v2473_v33 = vld [vmem:[#allocation3 + $0x25c] ss:$12 sps:$4 sm:$0xff]   ;;  %v329_v42 = vshrl.u32 %v328_v41, 7  ;;  %v2484_v26 = vld [vmem:[#allocation3 + $0x158] ss:$12 sps:$4 sm:$0xff]  }
  0x3c   : > { %v2480_v39 = vld [vmem:[#allocation3 + $0x170] ss:$12 sps:$4 sm:$0xff]   ;;  %v2487_v41 = vld [vmem:[#allocation3 + $0x218] ss:$12 sps:$4 sm:$0xff]  }
  0x3d   : > { %v2482_v40 = vld [vmem:[#allocation3 + $0x2f0] ss:$12 sps:$4 sm:$0xff]   ;;  %v2723_v43 = vsub.s32 1, %v329_v42  ;;  %v342_v44 = vsub.s32 3, %v329_v42  ;;  %v2725_v45 = vsub.s32 0, %v329_v42  ;;  %v2727_v46 = vsub.s32 2, %v329_v42 }
  0x3e   : > { %1389 = vmatpush1.bf16.msra.mxu0 %v2414_v48  ;;  %1502 = vmatpush1.bf16.msra.mxu1 %v2417_v49  ;;  %v326_v47 = vld [vmem:[%s3143_s2] sm:$0xf] }
  0x3f   : > { %1390 = vmatprep.subr.bf16.mxu0 %v2422_v51  ;;  %1503 = vmatprep.subr.bf16.mxu1 %v2425_v52  ;;  %v2735_v51 = vrot.slane %v326_v47, %v342_v44  ;;  %v2738_v52 = vrot.slane %v326_v47, %v2725_v45  ;;  %v2741_v53 = vrot.slane %v326_v47, %v2727_v46  ;;  %v2488_v42 = vld [vmem:[#allocation3 + $0x140] ss:$12 sps:$4 sm:$0xff]  }
  0x40   : > { %2117 = vmatmul.mubr.msk.bf16.gmra.mxu0 %vm358_vm2, %v319_v50  ;;  %2125 = vmatmul.mubr.msk.bf16.gmra.mxu1 %vm358_vm2, %v319_v50  ;;  %v2733_v50 = vrot.slane %v326_v47, %v2723_v43 }
  0x41   : > { %471 = vmatprep.mubr.bf16.mxu0 %v2585_v1  ;;  %584 = vmatprep.mubr.bf16.mxu1 %v2585_v1 }
  0x42   : > { %1391 = vmatpush1.bf16.msra.mxu0 %v2420_v54  ;;  %1504 = vmatpush1.bf16.msra.mxu1 %v2423_v55 }
  0x43   : > { %1392 = vmatprep.subr.bf16.mxu0 %v2428_v56  ;;  %1505 = vmatprep.subr.bf16.mxu1 %v2431_v57 }
  0x46   : > { %1393 = vmatpush1.bf16.msra.mxu0 %v2426_v59  ;;  %1506 = vmatpush1.bf16.msra.mxu1 %v2429_v60 }
  0x47   : > { %1394 = vmatprep.subr.bf16.mxu0 %v2434_v63  ;;  %1507 = vmatprep.subr.bf16.mxu1 %v2437_v0 }
  0x48   : > { %2118 = vmatmul.mubr.msk.bf16.gmra.mxu0 %vm358_vm2, %v320_v61  ;;  %2126 = vmatmul.mubr.msk.bf16.gmra.mxu1 %vm358_vm2, %v320_v61 }
  0x49   : > { %481 = vmatprep.mubr.bf16.mxu0 %v2585_v1  ;;  %594 = vmatprep.mubr.bf16.mxu1 %v2585_v1 }
  0x4a   : > { %1395 = vmatpush2.bf16.msra.mxu0 %v2432_v62  ;;  %1508 = vmatpush2.bf16.msra.mxu1 %v2435_v4 }
  0x4b   : > { %1396 = vmatprep.subr.bf16.mxu0 %v2440_v5  ;;  %1509 = vmatprep.subr.bf16.mxu1 %v2443_v6 }
  0x4e   : > { %1397 = vmatpush2.bf16.msra.mxu0 %v2438_v7  ;;  %1510 = vmatpush2.bf16.msra.mxu1 %v2441_v8 }
  0x4f   : > { %1398 = vmatprep.subr.bf16.mxu0 %v2446_v10  ;;  %1511 = vmatprep.subr.bf16.mxu1 %v2449_v11 }
  0x50   : > { %2119 = vmatmul.mubr.msk.bf16.gmra.mxu0 %vm358_vm2, %v321_v9  ;;  %2127 = vmatmul.mubr.msk.bf16.gmra.mxu1 %vm358_vm2, %v321_v9 }
  0x51   : > { %491 = vmatprep.mubr.bf16.mxu0 %v2585_v1  ;;  %604 = vmatprep.mubr.bf16.mxu1 %v2585_v1 }
  0x52   : > { %1399 = vmatpush2.bf16.msra.mxu0 %v2444_v12  ;;  %1512 = vmatpush2.bf16.msra.mxu1 %v2447_v13 }
  0x53   : > { %1400 = vmatprep.subr.bf16.mxu0 %v2452_v14  ;;  %1513 = vmatprep.subr.bf16.mxu1 %v2455_v15 }
  0x56   : > { %1401 = vmatpush2.bf16.msra.mxu0 %v2450_v18  ;;  %1514 = vmatpush2.bf16.msra.mxu1 %v2453_v19  ;;  %v2481_v19 = vld [vmem:[#allocation3 + $0xb0] ss:$12 sps:$4 sm:$0xff]  }
  0x57   : > { %1402 = vmatprep.subr.bf16.mxu0 %v2458_v21  ;;  %1515 = vmatprep.subr.bf16.mxu1 %v2461_v22 }
  0x58   : > { %2120 = vmatmul.mubr.msk.bf16.gmra.mxu0 %vm358_vm2, %v322_v20  ;;  %2128 = vmatmul.mubr.msk.bf16.gmra.mxu1 %vm358_vm2, %v322_v20  ;;  %v2483_v20 = vld [vmem:[#allocation3 + $0x230] ss:$12 sps:$4 sm:$0xff]  }
  0x59   : > { %501 = vmatprep.mubr.bf16.mxu0 %v2585_v1  ;;  %614 = vmatprep.mubr.bf16.mxu1 %v2585_v1  ;;  %v2468_v1 = vld [vmem:[#allocation3 + $0xd8] ss:$12 sps:$4 sm:$0xff]  }
  0x5a   : > { %1403 = vmatpush2.bf16.msra.mxu0 %v2456_v23  ;;  %1516 = vmatpush2.bf16.msra.mxu1 %v2459_v24 }
  0x5b   : > { %1404 = vmatprep.subr.bf16.mxu0 %v2464_v28  ;;  %1517 = vmatprep.subr.bf16.mxu1 %v2467_v29 }
  0x5e   : > { %1405 = vmatpush2.bf16.msra.mxu0 %v2462_v30  ;;  %1518 = vmatpush2.bf16.msra.mxu1 %v2465_v31 }
  0x5f   : > { %1406 = vmatprep.subr.bf16.mxu0 %v2470_v32  ;;  %1519 = vmatprep.subr.bf16.mxu1 %v2473_v33 }
  0x60   : > { %2121 = vmatmul.mubr.msk.bf16.gmra.mxu0 %vm358_vm2, %v323_v27  ;;  %2129 = vmatmul.mubr.msk.bf16.gmra.mxu1 %vm358_vm2, %v323_v27  ;;  %v2486_v27 = vld [vmem:[#allocation3 + $0x2d8] ss:$12 sps:$4 sm:$0xff]  }
  0x62   : > { %1407 = vmatpush2.bf16.msra.mxu0 %v2468_v1  ;;  %1520 = vmatpush2.bf16.msra.mxu1 %v2471_v34 }
  0x63   : > { %1408 = vmatprep.subr.bf16.mxu0 %v2476_v35  ;;  %1521 = vmatprep.subr.bf16.mxu1 %v2479_v36  ;;  %v2485_v36 = vld [vmem:[#allocation3 + $0x98] ss:$12 sps:$4 sm:$0xff]  }
  0x66   : > { %1409 = vmatpush2.bf16.msra.mxu0 %v2474_v37  ;;  %1522 = vmatpush2.bf16.msra.mxu1 %v2477_v38 }
  0x67   : > { %2229 = vmatprep.subr.bf16.mxu0 %v2480_v39  ;;  %2293 = vmatprep.subr.bf16.mxu1 %v2482_v40 }
  0xe8   : > { %v433_v48 = vpop.f32.mrf.mxu0  ;;  %v546_v49 = vpop.f32.mrf.mxu1 }
  0xe9   : > { %v434_v62 = vadd.f32 %v433_v48, %v2738_v52  ;;  %v547_v63 = vadd.f32 %v546_v49, %v2741_v53 }
  0xea   : > { %v435_v54 = vpop.f32.mrf.mxu0  ;;  %v548_v55 = vpop.f32.mrf.mxu1 }
  0xeb   : > { %v436_v58 = vadd.f32 %v435_v54, %v2733_v50  ;;  %v549_v59 = vadd.f32 %v548_v55, %v2735_v51  ;;  %v625_v13 = vmax.f32 %v434_v62, 0.0  ;;  %v627_v14 = vmax.f32 %v547_v63, 0.0 }
  0xec   : > { %v437_v56 = vpop.f32.mrf.mxu0  ;;  %v550_v57 = vpop.f32.mrf.mxu1 }
  0xed   : > { %v438_v60 = vadd.f32 %v437_v56, %v2738_v52  ;;  %v551_v61 = vadd.f32 %v550_v57, %v2741_v53  ;;  %v626_v9 = vmax.f32 %v436_v58, 0.0  ;;  %v628_v10 = vmax.f32 %v549_v59, 0.0 }
  0xee   : > { %v439_v0 = vpop.f32.mrf.mxu0  ;;  %v552_v2 = vpop.f32.mrf.mxu1 }
  0xef   : > { %v440_v3 = vadd.f32 %v439_v0, %v2733_v50  ;;  %v553_v4 = vadd.f32 %v552_v2, %v2735_v51  ;;  %v629_v5 = vmax.f32 %v438_v60, 0.0  ;;  %v631_v6 = vmax.f32 %v551_v61, 0.0  ;;  %v2489_v60 = vld [vmem:[#allocation3 + $0x80] ss:$12 sps:$4 sm:$0xff]  }
  0xf0   : > { %v443_v7 = vpop.f32.mrf.mxu0  ;;  %v556_v8 = vpop.f32.mrf.mxu1  ;;  %v2490_v61 = vld [vmem:[#allocation3 + $0x2c0] ss:$12 sps:$4 sm:$0xff]  }
  0xf1   : > { %v630_v11 = vmax.f32 %v440_v3, 0.0  ;;  %v632_v12 = vmax.f32 %v553_v4, 0.0  ;;  %v2755_v21 = vpack.c.bf16 %v629_v5, %v625_v13  ;;  %v2757_v22 = vpack.c.bf16 %v631_v6, %v627_v14  ;;  %v2491_v4 = vld [vmem:[#allocation3 + $0x200] ss:$12 sps:$4 sm:$0xff]   ;;  %v2492_v5 = vld [vmem:[#allocation3 + $0x128] ss:$12 sps:$4 sm:$0xff]  }
  0xf2   : > { %v445_v15 = vpop.f32.mrf.mxu0  ;;  %v558_v16 = vpop.f32.mrf.mxu1  ;;  %v444_v31 = vadd.f32 %v443_v7, %v2738_v52  ;;  %v557_v32 = vadd.f32 %v556_v8, %v2741_v53 }
  0xf3   : > { %v2751_v17 = vpack.c.bf16 %v630_v11, %v626_v9  ;;  %v2753_v18 = vpack.c.bf16 %v632_v12, %v628_v10  ;;  %v446_v23 = vadd.f32 %v445_v15, %v2733_v50  ;;  %v559_v28 = vadd.f32 %v558_v16, %v2735_v51  ;;  %v2494_v9 = vld [vmem:[#allocation3 + $0x2a8] ss:$12 sps:$4 sm:$0xff]  }
  0xf4   : > { %v447_v24 = vpop.f32.mrf.mxu0  ;;  %v560_v25 = vpop.f32.mrf.mxu1  ;;  %v633_v54 = vmax.f32 %v444_v31, 0.0  ;;  %v635_v55 = vmax.f32 %v557_v32, 0.0  ;;  %v2493_v16 = vld [vmem:[#allocation3 + $0x68] ss:$12 sps:$4 sm:$0xff]  }
  0xf5   : > { %v448_v29 = vadd.f32 %v447_v24, %v2738_v52  ;;  %v561_v30 = vadd.f32 %v560_v25, %v2741_v53  ;;  %1410 = vmatprep.mubr.bf16.mxu0 %v2751_v17  ;;  %1523 = vmatprep.mubr.bf16.mxu1 %v2753_v18  ;;  %v634_v44 = vmax.f32 %v446_v23, 0.0  ;;  %v636_v47 = vmax.f32 %v559_v28, 0.0  ;;  %v2495_v25 = vld [vmem:[#allocation3 + $0x1e8] ss:$12 sps:$4 sm:$0xff]  }
  0xf6   : > { %v449_v33 = vpop.f32.mrf.mxu0  ;;  %v562_v1 = vpop.f32.mrf.mxu1  ;;  %1411 = vmatmul.mubr.bf16.vlgmr.msra.gmra.mxu0 %v2755_v21  ;;  %1524 = vmatmul.mubr.bf16.vlgmr.msra.gmra.mxu1 %v2757_v22 }
  0xf7   : > { %v450_v34 = vadd.f32 %v449_v33, %v2733_v50  ;;  %v563_v35 = vadd.f32 %v562_v1, %v2735_v51  ;;  %2230 = vmatpush3.bf16.msra.mxu0 %v2481_v19  ;;  %2294 = vmatpush3.bf16.msra.mxu1 %v2483_v20  ;;  %v637_v37 = vmax.f32 %v448_v29, 0.0  ;;  %v639_v38 = vmax.f32 %v561_v30, 0.0 }
  0xf8   : > { %v453_v39 = vpop.f32.mrf.mxu0  ;;  %v566_v40 = vpop.f32.mrf.mxu1  ;;  %2231 = vmatprep.subr.bf16.mxu0 %v2484_v26  ;;  %2295 = vmatprep.subr.bf16.mxu1 %v2486_v27  ;;  %v2496_v26 = vld [vmem:[#allocation3 + $0x110] ss:$12 sps:$4 sm:$0xff]  }
  0xf9   : > { %v638_v48 = vmax.f32 %v450_v34, 0.0  ;;  %v640_v49 = vmax.f32 %v563_v35, 0.0  ;;  %v2775_v62 = vpack.c.bf16 %v637_v37, %v633_v54  ;;  %v2777_v63 = vpack.c.bf16 %v639_v38, %v635_v55  ;;  %v2498_v37 = vld [vmem:[#allocation3 + $0x290] ss:$12 sps:$4 sm:$0xff]   ;;  %v2502_v55 = vld [vmem:[#allocation3 + $0x278] ss:$12 sps:$4 sm:$0xff]  }
  0xfa   : > { %v455_v56 = vpop.f32.mrf.mxu0  ;;  %v568_v57 = vpop.f32.mrf.mxu1  ;;  %v454_v10 = vadd.f32 %v453_v39, %v2738_v52  ;;  %v567_v11 = vadd.f32 %v566_v40, %v2741_v53 }
  0xfb   : > { %v2771_v58 = vpack.c.bf16 %v638_v48, %v634_v44  ;;  %v2773_v59 = vpack.c.bf16 %v640_v49, %v636_v47  ;;  %2232 = vmatpush3.bf16.msra.mxu0 %v2485_v36  ;;  %v456_v0 = vadd.f32 %v455_v56, %v2733_v50  ;;  %2296 = vmatpush3.bf16.msra.mxu1 %v2487_v41  ;;  %v2497_v36 = vld [vmem:[#allocation3 + $0x50] ss:$12 sps:$4 sm:$0xff]   ;;  %v2500_v47 = vld [vmem:[#allocation3 + $0xf8] ss:$12 sps:$4 sm:$0xff]  }
  0xfc   : > { %v457_v2 = vpop.f32.mrf.mxu0  ;;  %v570_v3 = vpop.f32.mrf.mxu1  ;;  %2233 = vmatprep.subr.bf16.mxu0 %v2488_v42  ;;  %v569_v6 = vadd.f32 %v568_v57, %v2735_v51  ;;  %2297 = vmatprep.subr.bf16.mxu1 %v2490_v61  ;;  %v641_v31 = vmax.f32 %v454_v10, 0.0  ;;  %v643_v32 = vmax.f32 %v567_v11, 0.0  ;;  %v2499_v44 = vld [vmem:[#allocation3 + $0x1d0] ss:$12 sps:$4 sm:$0xff]  }
  0xfd   : > { %v458_v7 = vadd.f32 %v457_v2, %v2738_v52  ;;  %v571_v8 = vadd.f32 %v570_v3, %v2741_v53  ;;  %1420 = vmatprep.mubr.bf16.mxu0 %v2771_v58  ;;  %1533 = vmatprep.mubr.bf16.mxu1 %v2773_v59  ;;  %v642_v27 = vmax.f32 %v456_v0, 0.0  ;;  %v2501_v3 = vld [vmem:[#allocation3 + $0x38] ss:$12 sps:$4 sm:$0xff]  }
  0xfe   : > { %v459_v12 = vpop.f32.mrf.mxu0  ;;  %v572_v13 = vpop.f32.mrf.mxu1  ;;  %1421 = vmatmul.mubr.bf16.gmra.mxu0 %v2775_v62  ;;  %1534 = vmatmul.mubr.bf16.gmra.mxu1 %v2777_v63  ;;  %v644_v28 = vmax.f32 %v569_v6, 0.0 }
  0xff   : > { %v460_v14 = vadd.f32 %v459_v12, %v2733_v50  ;;  %v573_v15 = vadd.f32 %v572_v13, %v2735_v51  ;;  %2234 = vmatpush3.bf16.msra.mxu0 %v2489_v60  ;;  %v645_v19 = vmax.f32 %v458_v7, 0.0  ;;  %v647_v20 = vmax.f32 %v571_v8, 0.0  ;;  %2298 = vmatpush3.bf16.msra.mxu1 %v2491_v4  ;;  %v2503_v8 = vld [vmem:[#allocation3 + $0x1b8] ss:$12 sps:$4 sm:$0xff]  }
 0x100   : > { %v463_v23 = vpop.f32.mrf.mxu0  ;;  %v576_v24 = vpop.f32.mrf.mxu1  ;;  %2235 = vmatprep.subr.bf16.mxu0 %v2492_v5  ;;  %2299 = vmatprep.subr.bf16.mxu1 %v2494_v9  ;;  %v2504_v9 = vld [vmem:[#allocation3 + $0xe0] ss:$12 sps:$4 sm:$0xff]  }
 0x101   : > { %v646_v29 = vmax.f32 %v460_v14, 0.0  ;;  %v648_v30 = vmax.f32 %v573_v15, 0.0  ;;  %v2795_v38 = vpack.c.bf16 %v645_v19, %v641_v31  ;;  %v2797_v39 = vpack.c.bf16 %v647_v20, %v643_v32  ;;  %v2507_v31 = vld [vmem:[#allocation3 + $0x1a0] ss:$12 sps:$4 sm:$0xff]   ;;  %v2508_v32 = vld [vmem:[#allocation3 + $0xc8] ss:$12 sps:$4 sm:$0xff]  }
 0x102   : > { %v465_v33 = vpop.f32.mrf.mxu0  ;;  %v578_v1 = vpop.f32.mrf.mxu1  ;;  %v464_v56 = vadd.f32 %v463_v23, %v2738_v52  ;;  %v577_v57 = vadd.f32 %v576_v24, %v2741_v53  ;;  %v2505_v24 = vld [vmem:[#allocation3 + $0x20] ss:$12 sps:$4 sm:$0xff]  }
 0x103   : > { %v2791_v34 = vpack.c.bf16 %v646_v29, %v642_v27  ;;  %v2793_v35 = vpack.c.bf16 %v648_v30, %v644_v28  ;;  %2236 = vmatpush3.bf16.msra.mxu0 %v2493_v16  ;;  %v466_v40 = vadd.f32 %v465_v33, %v2733_v50  ;;  %2300 = vmatpush3.bf16.msra.mxu1 %v2495_v25  ;;  %v2506_v25 = vld [vmem:[#allocation3 + $0x260] ss:$12 sps:$4 sm:$0xff]  }
 0x104   : > { %v467_v41 = vpop.f32.mrf.mxu0  ;;  %v580_v42 = vpop.f32.mrf.mxu1  ;;  %2237 = vmatprep.subr.bf16.mxu0 %v2496_v26  ;;  %v579_v48 = vadd.f32 %v578_v1, %v2735_v51  ;;  %2301 = vmatprep.subr.bf16.mxu1 %v2498_v37  ;;  %v649_v14 = vmax.f32 %v464_v56, 0.0  ;;  %v651_v15 = vmax.f32 %v577_v57, 0.0  ;;  %v2510_v37 = vld [vmem:[#allocation3 + $0x248] ss:$12 sps:$4 sm:$0xff]  }
 0x105   : > { %v468_v49 = vadd.f32 %v467_v41, %v2738_v52  ;;  %v581_v54 = vadd.f32 %v580_v42, %v2741_v53  ;;  %1430 = vmatprep.mubr.bf16.mxu0 %v2791_v34  ;;  %1543 = vmatprep.mubr.bf16.mxu1 %v2793_v35  ;;  %v650_v10 = vmax.f32 %v466_v40, 0.0 }
 0x106   : > { %v469_v60 = vpop.f32.mrf.mxu0  ;;  %v582_v61 = vpop.f32.mrf.mxu1  ;;  %1431 = vmatmul.mubr.bf16.gmra.mxu0 %v2795_v38  ;;  %1544 = vmatmul.mubr.bf16.gmra.mxu1 %v2797_v39  ;;  %v652_v11 = vmax.f32 %v579_v48, 0.0 }
 0x107   : > { %v470_v0 = vadd.f32 %v469_v60, %v2733_v50  ;;  %v583_v2 = vadd.f32 %v582_v61, %v2735_v51  ;;  %2238 = vmatpush3.bf16.msra.mxu0 %v2497_v36  ;;  %v653_v4 = vmax.f32 %v468_v49, 0.0  ;;  %v655_v5 = vmax.f32 %v581_v54, 0.0  ;;  %2302 = vmatpush3.bf16.msra.mxu1 %v2499_v44  ;;  %v2509_v49 = vld [vmem:[#allocation3 + $0x8] ss:$12 sps:$4 sm:$0xff]  }
 0x108   : > { %v473_v6 = vpop.f32.mrf.mxu0  ;;  %v586_v7 = vpop.f32.mrf.mxu1  ;;  %2239 = vmatprep.subr.bf16.mxu0 %v2500_v47  ;;  %2303 = vmatprep.subr.bf16.mxu1 %v2502_v55  ;;  %v2511_v60 = vld [vmem:[#allocation3 + $0x188] ss:$12 sps:$4 sm:$0xff]  }
 0x109   : > { %v654_v12 = vmax.f32 %v470_v0, 0.0  ;;  %v656_v13 = vmax.f32 %v583_v2, 0.0  ;;  %v2815_v26 = vpack.c.bf16 %v653_v4, %v649_v14  ;;  %v2817_v27 = vpack.c.bf16 %v655_v5, %v651_v15 }
 0x10a   : > { %v475_v16 = vpop.f32.mrf.mxu0  ;;  %v588_v19 = vpop.f32.mrf.mxu1  ;;  %v474_v40 = vadd.f32 %v473_v6, %v2738_v52  ;;  %v587_v41 = vadd.f32 %v586_v7, %v2741_v53 }
 0x10b   : > { %v2811_v20 = vpack.c.bf16 %v654_v12, %v650_v10  ;;  %v2813_v23 = vpack.c.bf16 %v656_v13, %v652_v11  ;;  %2240 = vmatpush3.bf16.msra.mxu0 %v2501_v3  ;;  %v476_v28 = vadd.f32 %v475_v16, %v2733_v50  ;;  %2304 = vmatpush3.bf16.msra.mxu1 %v2503_v8 }
 0x10c   : > { %v477_v29 = vpop.f32.mrf.mxu0  ;;  %v590_v30 = vpop.f32.mrf.mxu1  ;;  %2241 = vmatprep.subr.bf16.mxu0 %v2504_v9  ;;  %v589_v33 = vadd.f32 %v588_v19, %v2735_v51  ;;  %2305 = vmatprep.subr.bf16.mxu1 %v2506_v25  ;;  %v657_v4 = vmax.f32 %v474_v40, 0.0  ;;  %v659_v5 = vmax.f32 %v587_v41, 0.0 }
 0x10d   : > { %v478_v1 = vadd.f32 %v477_v29, %v2738_v52  ;;  %v591_v36 = vadd.f32 %v590_v30, %v2741_v53  ;;  %1440 = vmatprep.mubr.bf16.mxu0 %v2811_v20  ;;  %1553 = vmatprep.mubr.bf16.mxu1 %v2813_v23  ;;  %v658_v61 = vmax.f32 %v476_v28, 0.0 }
 0x10e   : > { %v479_v42 = vpop.f32.mrf.mxu0  ;;  %v592_v44 = vpop.f32.mrf.mxu1  ;;  %1441 = vmatmul.mubr.bf16.gmra.mxu0 %v2815_v26  ;;  %1554 = vmatmul.mubr.bf16.gmra.mxu1 %v2817_v27  ;;  %v660_v0 = vmax.f32 %v589_v33, 0.0 }
 0x10f   : > { %v480_v47 = vadd.f32 %v479_v42, %v2733_v50  ;;  %v593_v48 = vadd.f32 %v592_v44, %v2735_v51  ;;  %2242 = vmatpush3.bf16.msra.mxu0 %v2505_v24  ;;  %v661_v54 = vmax.f32 %v478_v1, 0.0  ;;  %v663_v55 = vmax.f32 %v591_v36, 0.0  ;;  %2306 = vmatpush3.bf16.msra.mxu1 %v2507_v31 }
 0x110   : > { %v483_v56 = vpop.f32.mrf.mxu0  ;;  %v596_v57 = vpop.f32.mrf.mxu1  ;;  %2243 = vmatprep.subr.bf16.mxu0 %v2508_v32  ;;  %2307 = vmatprep.subr.bf16.mxu1 %v2510_v37 }
 0x111   : > { %v662_v2 = vmax.f32 %v480_v47, 0.0  ;;  %v664_v3 = vmax.f32 %v593_v48, 0.0  ;;  %v2835_v10 = vpack.c.bf16 %v661_v54, %v657_v4  ;;  %v2837_v11 = vpack.c.bf16 %v663_v55, %v659_v5 }
 0x112   : > { %v485_v6 = vpop.f32.mrf.mxu0  ;;  %v598_v7 = vpop.f32.mrf.mxu1  ;;  %v484_v24 = vadd.f32 %v483_v56, %v2738_v52  ;;  %v597_v25 = vadd.f32 %v596_v57, %v2741_v53 }
 0x113   : > { %v2831_v8 = vpack.c.bf16 %v662_v2, %v658_v61  ;;  %v2833_v9 = vpack.c.bf16 %v664_v3, %v660_v0  ;;  %2244 = vmatpush3.bf16.msra.mxu0 %v2509_v49  ;;  %v486_v12 = vadd.f32 %v485_v6, %v2733_v50  ;;  %2308 = vmatpush3.bf16.msra.mxu1 %v2511_v60 }
 0x114   : > { %v487_v13 = vpop.f32.mrf.mxu0  ;;  %v600_v14 = vpop.f32.mrf.mxu1  ;;  %v599_v15 = vadd.f32 %v598_v7, %v2735_v51  ;;  %v665_v44 = vmax.f32 %v484_v24, 0.0  ;;  %v667_v47 = vmax.f32 %v597_v25, 0.0 }
 0x115   : > { %v488_v16 = vadd.f32 %v487_v13, %v2738_v52  ;;  %v601_v19 = vadd.f32 %v600_v14, %v2741_v53  ;;  %1450 = vmatprep.mubr.bf16.mxu0 %v2831_v8  ;;  %1563 = vmatprep.mubr.bf16.mxu1 %v2833_v9  ;;  %v666_v37 = vmax.f32 %v486_v12, 0.0 }
 0x116   : > { %v489_v28 = vpop.f32.mrf.mxu0  ;;  %v602_v29 = vpop.f32.mrf.mxu1  ;;  %1451 = vmatmul.mubr.bf16.gmra.mxu0 %v2835_v10  ;;  %1564 = vmatmul.mubr.bf16.gmra.mxu1 %v2837_v11  ;;  %v668_v40 = vmax.f32 %v599_v15, 0.0 }
 0x117   : > { %v490_v30 = vadd.f32 %v489_v28, %v2733_v50  ;;  %v603_v31 = vadd.f32 %v602_v29, %v2735_v51  ;;  %v669_v32 = vmax.f32 %v488_v16, 0.0  ;;  %v671_v33 = vmax.f32 %v601_v19, 0.0 }
 0x118   : > { %v493_v1 = vpop.f32.mrf.mxu0  ;;  %v606_v36 = vpop.f32.mrf.mxu1 }
 0x119   : > { %v670_v41 = vmax.f32 %v490_v30, 0.0  ;;  %v672_v42 = vmax.f32 %v603_v31, 0.0  ;;  %v2855_v56 = vpack.c.bf16 %v669_v32, %v665_v44  ;;  %v2857_v57 = vpack.c.bf16 %v671_v33, %v667_v47 }
 0x11a   : > { %v495_v48 = vpop.f32.mrf.mxu0  ;;  %v608_v49 = vpop.f32.mrf.mxu1  ;;  %v494_v5 = vadd.f32 %v493_v1, %v2738_v52  ;;  %v607_v6 = vadd.f32 %v606_v36, %v2741_v53 }
 0x11b   : > { %v2851_v54 = vpack.c.bf16 %v670_v41, %v666_v37  ;;  %v2853_v55 = vpack.c.bf16 %v672_v42, %v668_v40  ;;  %v496_v60 = vadd.f32 %v495_v48, %v2733_v50  ;;  %v609_v2 = vadd.f32 %v608_v49, %v2735_v51 }
 0x11c   : > { %v497_v61 = vpop.f32.mrf.mxu0  ;;  %v610_v0 = vpop.f32.mrf.mxu1  ;;  %v673_v31 = vmax.f32 %v494_v5, 0.0  ;;  %v675_v32 = vmax.f32 %v607_v6, 0.0 }
 0x11d   : > { %v498_v3 = vadd.f32 %v497_v61, %v2738_v52  ;;  %v611_v4 = vadd.f32 %v610_v0, %v2741_v53  ;;  %1460 = vmatprep.mubr.bf16.mxu0 %v2851_v54  ;;  %1573 = vmatprep.mubr.bf16.mxu1 %v2853_v55  ;;  %v674_v25 = vmax.f32 %v496_v60, 0.0  ;;  %v676_v28 = vmax.f32 %v609_v2, 0.0 }
 0x11e   : > { %v499_v7 = vpop.f32.mrf.mxu0  ;;  %v612_v12 = vpop.f32.mrf.mxu1  ;;  %1461 = vmatmul.mubr.bf16.gmra.mxu0 %v2855_v56  ;;  %1574 = vmatmul.mubr.bf16.gmra.mxu1 %v2857_v57 }
 0x11f   : > { %v500_v13 = vadd.f32 %v499_v7, %v2733_v50  ;;  %v613_v14 = vadd.f32 %v612_v12, %v2735_v51  ;;  %v677_v15 = vmax.f32 %v498_v3, 0.0  ;;  %v679_v16 = vmax.f32 %v611_v4, 0.0 }
 0x120   : > { %v503_v19 = vpop.f32.mrf.mxu0  ;;  %v616_v24 = vpop.f32.mrf.mxu1 }
 0x121   : > { %v678_v29 = vmax.f32 %v500_v13, 0.0  ;;  %v680_v30 = vmax.f32 %v613_v14, 0.0  ;;  %v713_v40 = vpack.c.bf16 %v677_v15, %v673_v31  ;;  %v715_v41 = vpack.c.bf16 %v679_v16, %v675_v32 }
 0x122   : > { %v505_v33 = vpop.f32.mrf.mxu0  ;;  %v618_v1 = vpop.f32.mrf.mxu1  ;;  %v504_v61 = vadd.f32 %v503_v19, %v2738_v52  ;;  %v617_v0 = vadd.f32 %v616_v24, %v2741_v53 }
 0x123   : > { %v714_v36 = vpack.c.bf16 %v678_v29, %v674_v25  ;;  %v716_v37 = vpack.c.bf16 %v680_v30, %v676_v28  ;;  %v506_v42 = vadd.f32 %v505_v33, %v2733_v50  ;;  %v619_v48 = vadd.f32 %v618_v1, %v2735_v51 }
 0x124   : > { %v507_v44 = vpop.f32.mrf.mxu0  ;;  %v620_v47 = vpop.f32.mrf.mxu1  ;;  %v681_v16 = vmax.f32 %v504_v61, 0.0  ;;  %v683_v25 = vmax.f32 %v617_v0, 0.0 }
 0x125   : > { %v508_v49 = vadd.f32 %v507_v44, %v2738_v52  ;;  %v621_v60 = vadd.f32 %v620_v47, %v2741_v53  ;;  %1470 = vmatprep.mubr.bf16.mxu0 %v714_v36  ;;  %1583 = vmatprep.mubr.bf16.mxu1 %v716_v37  ;;  %v682_v12 = vmax.f32 %v506_v42, 0.0  ;;  %v684_v13 = vmax.f32 %v619_v48, 0.0 }
 0x126   : > { %v509_v2 = vpop.f32.mrf.mxu0  ;;  %v622_v3 = vpop.f32.mrf.mxu1  ;;  %1471 = vmatmul.mubr.bf16.gmra.mxu0 %v713_v40  ;;  %1584 = vmatmul.mubr.bf16.gmra.mxu1 %v715_v41 }
 0x127   : > { %v510_v4 = vadd.f32 %v509_v2, %v2733_v50  ;;  %v623_v5 = vadd.f32 %v622_v3, %v2735_v51  ;;  %v685_v6 = vmax.f32 %v508_v49, 0.0  ;;  %v687_v7 = vmax.f32 %v621_v60, 0.0  ;;  %v2906_v50 = vld [vmem:[%s3145_s4] sm:$0x7] }
 0x128   : > { %v2910_v51 = vrot.slane %v2906_v50, %v2725_v45 }
 0x129   : > { %v686_v14 = vmax.f32 %v510_v4, 0.0  ;;  %v688_v15 = vmax.f32 %v623_v5, 0.0  ;;  %v717_v19 = vpack.c.bf16 %v685_v6, %v681_v16  ;;  %v719_v53 = vpack.c.bf16 %v687_v7, %v683_v25 }
 0x12b   : > { %v718_v28 = vpack.c.bf16 %v686_v14, %v682_v12  ;;  %v720_v52 = vpack.c.bf16 %v688_v15, %v684_v13 }
 0x12d   : > { %1480 = vmatprep.mubr.bf16.mxu0 %v718_v28  ;;  %1593 = vmatprep.mubr.bf16.mxu1 %v720_v52 }
 0x12e   : > { %1481 = vmatmul.mubr.bf16.gmra.mxu0 %v717_v19  ;;  %1594 = vmatmul.mubr.bf16.gmra.mxu1 %v719_v53 }
 0x12f   : > { %1636 = vmatprep.mubr.bf16.mxu0 %v2751_v17  ;;  %1733 = vmatprep.mubr.bf16.mxu1 %v2753_v18  ;;  %v2914_v17 = vrot.slane %v2906_v50, %v2723_v43 }
 0x136   : > { %1637 = vmatmul.mubr.bf16.vlgmr.msra.gmra.mxu0 %v2755_v21  ;;  %1734 = vmatmul.mubr.bf16.vlgmr.msra.gmra.mxu1 %v2757_v22 }
 0x137   : > { %1644 = vmatprep.mubr.bf16.mxu0 %v2771_v58  ;;  %1741 = vmatprep.mubr.bf16.mxu1 %v2773_v59 }
 0x13e   : > { %1645 = vmatmul.mubr.bf16.gmra.mxu0 %v2775_v62  ;;  %1742 = vmatmul.mubr.bf16.gmra.mxu1 %v2777_v63  ;;  %v2920_v63 = vld [vmem:[%s3146_s5] sm:$0x7] }
 0x13f   : > { %1652 = vmatprep.mubr.bf16.mxu0 %v2791_v34  ;;  %1749 = vmatprep.mubr.bf16.mxu1 %v2793_v35 }
 0x146   : > { %1653 = vmatmul.mubr.bf16.gmra.mxu0 %v2795_v38  ;;  %1750 = vmatmul.mubr.bf16.gmra.mxu1 %v2797_v39 }
 0x147   : > { %1660 = vmatprep.mubr.bf16.mxu0 %v2811_v20  ;;  %1757 = vmatprep.mubr.bf16.mxu1 %v2813_v23  ;;  %v2925_v20 = vrot.slane %v2920_v63, %v2723_v43 }
 0x14e   : > { %1661 = vmatmul.mubr.bf16.gmra.mxu0 %v2815_v26  ;;  %1758 = vmatmul.mubr.bf16.gmra.mxu1 %v2817_v27  ;;  %v2930_v27 = vrot.slane %v2920_v63, %v2725_v45 }
 0x14f   : > { %1668 = vmatprep.mubr.bf16.mxu0 %v2831_v8  ;;  %1765 = vmatprep.mubr.bf16.mxu1 %v2833_v9 }
 0x156   : > { %1669 = vmatmul.mubr.bf16.gmra.mxu0 %v2835_v10  ;;  %1766 = vmatmul.mubr.bf16.gmra.mxu1 %v2837_v11 }
 0x157   : > { %1676 = vmatprep.mubr.bf16.mxu0 %v2851_v54  ;;  %1773 = vmatprep.mubr.bf16.mxu1 %v2853_v55 }
 0x15e   : > { %1677 = vmatmul.mubr.bf16.gmra.mxu0 %v2855_v56  ;;  %1774 = vmatmul.mubr.bf16.gmra.mxu1 %v2857_v57 }
 0x15f   : > { %1684 = vmatprep.mubr.bf16.mxu0 %v714_v36  ;;  %1781 = vmatprep.mubr.bf16.mxu1 %v716_v37 }
 0x166   : > { %1685 = vmatmul.mubr.bf16.gmra.mxu0 %v713_v40  ;;  %1782 = vmatmul.mubr.bf16.gmra.mxu1 %v715_v41 }
 0x167   : > { %1692 = vmatprep.mubr.bf16.mxu0 %v718_v28  ;;  %1789 = vmatprep.mubr.bf16.mxu1 %v720_v52 }
 0x16e   : > { %1693 = vmatmul.mubr.bf16.gmra.mxu0 %v717_v19  ;;  %1790 = vmatmul.mubr.bf16.gmra.mxu1 %v719_v53 }
 0x1b6   : > { %v1412_v18 = vpop.f32.mrf.mxu0  ;;  %v1525_v21 = vpop.f32.mrf.mxu1 }
 0x1b7   : > { %v1413_v22 = vadd.f32 %v1412_v18, %v2910_v51 }
 0x1b8   : > { %v1414_v58 = vpop.f32.mrf.mxu0  ;;  %v1527_v59 = vpop.f32.mrf.mxu1 }
 0x1b9   : > { %v1526_v62 = vadd.f32 %v1525_v21, %v1413_v22  ;;  %v1415_v34 = vadd.f32 %v1414_v58, %v2914_v17 }
 0x1ba   : > { %v1416_v35 = vpop.f32.mrf.mxu0  ;;  %v1529_v38 = vpop.f32.mrf.mxu1 }
 0x1bb   : > { %v1528_v39 = vadd.f32 %v1527_v59, %v1415_v34  ;;  %v1417_v23 = vadd.f32 %v1416_v35, %v2910_v51  ;;  %v1798_v26 = vmax.f32 %v1526_v62, 0.0 }
 0x1bc   : > { %v1418_v8 = vpop.f32.mrf.mxu0  ;;  %v1531_v9 = vpop.f32.mrf.mxu1 }
 0x1bd   : > { %v1799_v10 = vmax.f32 %v1528_v39, 0.0  ;;  %v1530_v11 = vadd.f32 %v1529_v38, %v1417_v23  ;;  %v1419_v54 = vadd.f32 %v1418_v8, %v2914_v17  ;;  %v1863_v29 = vmul.f32 %v2930_v27, %v1798_v26 }
 0x1be   : > { %v1422_v55 = vpop.f32.mrf.mxu0  ;;  %v1535_v56 = vpop.f32.mrf.mxu1 }
 0x1bf   : > { %v1864_v57 = vmul.f32 %v2925_v20, %v1799_v10  ;;  %v1532_v24 = vadd.f32 %v1531_v9, %v1419_v54  ;;  %v1423_v43 = vadd.f32 %v1422_v55, %v2910_v51  ;;  %v1801_v30 = vmax.f32 %v1530_v11, 0.0 }
 0x1c0   : > { %v1424_v31 = vpop.f32.mrf.mxu0  ;;  %v1537_v32 = vpop.f32.mrf.mxu1 }
 0x1c1   : > { %v1802_v45 = vmax.f32 %v1532_v24, 0.0  ;;  %v1536_v33 = vadd.f32 %v1535_v56, %v1423_v43  ;;  %v1425_v1 = vadd.f32 %v1424_v31, %v2914_v17  ;;  %v2937_v40 = vadd.f32 %v1864_v57, %v1863_v29 }
 0x1c2   : > { %v1426_v36 = vpop.f32.mrf.mxu0  ;;  %v1539_v37 = vpop.f32.mrf.mxu1  ;;  %v1866_v47 = vmul.f32 %v2930_v27, %v1801_v30 }
 0x1c3   : > { %v1867_v41 = vmul.f32 %v2925_v20, %v1802_v45  ;;  %v1538_v42 = vadd.f32 %v1537_v32, %v1425_v1  ;;  %v1427_v44 = vadd.f32 %v1426_v36, %v2910_v51  ;;  %v1804_v48 = vmax.f32 %v1536_v33, 0.0 }
 0x1c4   : > { %v1428_v49 = vpop.f32.mrf.mxu0  ;;  %v1541_v60 = vpop.f32.mrf.mxu1 }
 0x1c5   : > { %v1805_v61 = vmax.f32 %v1538_v42, 0.0  ;;  %v1540_v0 = vadd.f32 %v1539_v37, %v1427_v44  ;;  %v1429_v2 = vadd.f32 %v1428_v49, %v2914_v17  ;;  %v2943_v5 = vadd.f32 %v1867_v41, %v1866_v47 }
 0x1c6   : > { %v1432_v3 = vpop.f32.mrf.mxu0  ;;  %v1545_v4 = vpop.f32.mrf.mxu1  ;;  %v1869_v13 = vmul.f32 %v2930_v27, %v1804_v48 }
 0x1c7   : > { %v1870_v6 = vmul.f32 %v2925_v20, %v1805_v61  ;;  %v1542_v7 = vadd.f32 %v1541_v60, %v1429_v2  ;;  %v1433_v12 = vadd.f32 %v1432_v3, %v2910_v51  ;;  %v1807_v14 = vmax.f32 %v1540_v0, 0.0 }
 0x1c8   : > { %v1434_v15 = vpop.f32.mrf.mxu0  ;;  %v1547_v16 = vpop.f32.mrf.mxu1 }
 0x1c9   : > { %v1808_v25 = vmax.f32 %v1542_v7, 0.0  ;;  %v1546_v28 = vadd.f32 %v1545_v4, %v1433_v12  ;;  %v1435_v52 = vadd.f32 %v1434_v15, %v2914_v17  ;;  %v2949_v18 = vadd.f32 %v1870_v6, %v1869_v13 }
 0x1ca   : > { %v1436_v19 = vpop.f32.mrf.mxu0  ;;  %v1549_v53 = vpop.f32.mrf.mxu1  ;;  %v1872_v59 = vmul.f32 %v2930_v27, %v1807_v14 }
 0x1cb   : > { %v1873_v21 = vmul.f32 %v2925_v20, %v1808_v25  ;;  %v1548_v22 = vadd.f32 %v1547_v16, %v1435_v52  ;;  %v1437_v58 = vadd.f32 %v1436_v19, %v2910_v51  ;;  %v1810_v62 = vmax.f32 %v1546_v28, 0.0 }
 0x1cc   : > { %v1438_v34 = vpop.f32.mrf.mxu0  ;;  %v1551_v35 = vpop.f32.mrf.mxu1 }
 0x1cd   : > { %v1811_v38 = vmax.f32 %v1548_v22, 0.0  ;;  %v1550_v39 = vadd.f32 %v1549_v53, %v1437_v58  ;;  %v1439_v23 = vadd.f32 %v1438_v34, %v2914_v17  ;;  %v2955_v9 = vadd.f32 %v1873_v21, %v1872_v59 }
 0x1ce   : > { %v1442_v26 = vpop.f32.mrf.mxu0  ;;  %v1555_v8 = vpop.f32.mrf.mxu1  ;;  %v1875_v55 = vmul.f32 %v2930_v27, %v1810_v62 }
 0x1cf   : > { %v1876_v10 = vmul.f32 %v2925_v20, %v1811_v38  ;;  %v1552_v11 = vadd.f32 %v1551_v35, %v1439_v23  ;;  %v1443_v54 = vadd.f32 %v1442_v26, %v2910_v51  ;;  %v1813_v56 = vmax.f32 %v1550_v39, 0.0 }
 0x1d0   : > { %v1444_v57 = vpop.f32.mrf.mxu0  ;;  %v1557_v24 = vpop.f32.mrf.mxu1 }
 0x1d1   : > { %v1814_v43 = vmax.f32 %v1552_v11, 0.0  ;;  %v1556_v29 = vadd.f32 %v1555_v8, %v1443_v54  ;;  %v1445_v30 = vadd.f32 %v1444_v57, %v2914_v17  ;;  %v2961_v45 = vadd.f32 %v1876_v10, %v1875_v55 }
 0x1d2   : > { %v1446_v31 = vpop.f32.mrf.mxu0  ;;  %v1559_v32 = vpop.f32.mrf.mxu1  ;;  %v1878_v37 = vmul.f32 %v2930_v27, %v1813_v56 }
 0x1d3   : > { %v1879_v33 = vmul.f32 %v2925_v20, %v1814_v43  ;;  %v1558_v1 = vadd.f32 %v1557_v24, %v1445_v30  ;;  %v1447_v36 = vadd.f32 %v1446_v31, %v2910_v51  ;;  %v1816_v41 = vmax.f32 %v1556_v29, 0.0 }
 0x1d4   : > { %v1448_v42 = vpop.f32.mrf.mxu0  ;;  %v1561_v44 = vpop.f32.mrf.mxu1 }
 0x1d5   : > { %v1817_v47 = vmax.f32 %v1558_v1, 0.0  ;;  %v1560_v48 = vadd.f32 %v1559_v32, %v1447_v36  ;;  %v1449_v49 = vadd.f32 %v1448_v42, %v2914_v17  ;;  %v2967_v0 = vadd.f32 %v1879_v33, %v1878_v37 }
 0x1d6   : > { %v1452_v60 = vpop.f32.mrf.mxu0  ;;  %v1565_v61 = vpop.f32.mrf.mxu1  ;;  %v1881_v6 = vmul.f32 %v2930_v27, %v1816_v41 }
 0x1d7   : > { %v1882_v2 = vmul.f32 %v2925_v20, %v1817_v47  ;;  %v1562_v3 = vadd.f32 %v1561_v44, %v1449_v49  ;;  %v1453_v4 = vadd.f32 %v1452_v60, %v2910_v51  ;;  %v1819_v7 = vmax.f32 %v1560_v48, 0.0 }
 0x1d8   : > { %v1454_v12 = vpop.f32.mrf.mxu0  ;;  %v1567_v13 = vpop.f32.mrf.mxu1 }
 0x1d9   : > { %v1820_v14 = vmax.f32 %v1562_v3, 0.0  ;;  %v1566_v15 = vadd.f32 %v1565_v61, %v1453_v4  ;;  %v1455_v16 = vadd.f32 %v1454_v12, %v2914_v17  ;;  %v2973_v52 = vadd.f32 %v1882_v2, %v1881_v6 }
 0x1da   : > { %v1456_v25 = vpop.f32.mrf.mxu0  ;;  %v1569_v28 = vpop.f32.mrf.mxu1  ;;  %v1884_v22 = vmul.f32 %v2930_v27, %v1819_v7 }
 0x1db   : > { %v1885_v19 = vmul.f32 %v2925_v20, %v1820_v14  ;;  %v1568_v53 = vadd.f32 %v1567_v13, %v1455_v16  ;;  %v1457_v21 = vadd.f32 %v1456_v25, %v2910_v51  ;;  %v1822_v58 = vmax.f32 %v1566_v15, 0.0 }
 0x1dc   : > { %v1458_v59 = vpop.f32.mrf.mxu0  ;;  %v1571_v62 = vpop.f32.mrf.mxu1 }
 0x1dd   : > { %v1823_v34 = vmax.f32 %v1568_v53, 0.0  ;;  %v1570_v35 = vadd.f32 %v1569_v28, %v1457_v21  ;;  %v1459_v38 = vadd.f32 %v1458_v59, %v2914_v17  ;;  %v2979_v26 = vadd.f32 %v1885_v19, %v1884_v22 }
 0x1de   : > { %v1462_v39 = vpop.f32.mrf.mxu0  ;;  %v1575_v23 = vpop.f32.mrf.mxu1  ;;  %v1887_v54 = vmul.f32 %v2930_v27, %v1822_v58 }
 0x1df   : > { %v1888_v8 = vmul.f32 %v2925_v20, %v1823_v34  ;;  %v1572_v10 = vadd.f32 %v1571_v62, %v1459_v38  ;;  %v1463_v11 = vadd.f32 %v1462_v39, %v2910_v51  ;;  %v1825_v55 = vmax.f32 %v1570_v35, 0.0 }
 0x1e0   : > { %v1464_v56 = vpop.f32.mrf.mxu0  ;;  %v1577_v57 = vpop.f32.mrf.mxu1 }
 0x1e1   : > { %v1826_v24 = vmax.f32 %v1572_v10, 0.0  ;;  %v1576_v43 = vadd.f32 %v1575_v23, %v1463_v11  ;;  %v1465_v29 = vadd.f32 %v1464_v56, %v2914_v17  ;;  %v2985_v32 = vadd.f32 %v1888_v8, %v1887_v54 }
 0x1e2   : > { %v1466_v30 = vpop.f32.mrf.mxu0  ;;  %v1579_v31 = vpop.f32.mrf.mxu1  ;;  %v1890_v37 = vmul.f32 %v2930_v27, %v1825_v55 }
 0x1e3   : > { %v1891_v33 = vmul.f32 %v2925_v20, %v1826_v24  ;;  %v1578_v1 = vadd.f32 %v1577_v57, %v1465_v29  ;;  %v1467_v36 = vadd.f32 %v1466_v30, %v2910_v51  ;;  %v1828_v41 = vmax.f32 %v1576_v43, 0.0 }
 0x1e4   : > { %v1468_v42 = vpop.f32.mrf.mxu0  ;;  %v1581_v44 = vpop.f32.mrf.mxu1 }
 0x1e5   : > { %v1829_v47 = vmax.f32 %v1578_v1, 0.0  ;;  %v1580_v48 = vadd.f32 %v1579_v31, %v1467_v36  ;;  %v1469_v49 = vadd.f32 %v1468_v42, %v2914_v17  ;;  %v2991_v2 = vadd.f32 %v1891_v33, %v1890_v37 }
 0x1e6   : > { %v1472_v60 = vpop.f32.mrf.mxu0  ;;  %v1585_v61 = vpop.f32.mrf.mxu1  ;;  %v1893_v7 = vmul.f32 %v2930_v27, %v1828_v41 }
 0x1e7   : > { %v1894_v3 = vmul.f32 %v2925_v20, %v1829_v47  ;;  %v1582_v4 = vadd.f32 %v1581_v44, %v1469_v49  ;;  %v1473_v6 = vadd.f32 %v1472_v60, %v2910_v51  ;;  %v1831_v12 = vmax.f32 %v1580_v48, 0.0 }
 0x1e8   : > { %v1474_v13 = vpop.f32.mrf.mxu0  ;;  %v1587_v14 = vpop.f32.mrf.mxu1 }
 0x1e9   : > { %v1832_v15 = vmax.f32 %v1582_v4, 0.0  ;;  %v1586_v16 = vadd.f32 %v1585_v61, %v1473_v6  ;;  %v1475_v25 = vadd.f32 %v1474_v13, %v2914_v17  ;;  %v2997_v53 = vadd.f32 %v1894_v3, %v1893_v7 }
 0x1ea   : > { %v1476_v28 = vpop.f32.mrf.mxu0  ;;  %v1589_v19 = vpop.f32.mrf.mxu1  ;;  %v1896_v59 = vmul.f32 %v2930_v27, %v1831_v12 }
 0x1eb   : > { %v1897_v21 = vmul.f32 %v2925_v20, %v1832_v15  ;;  %v1588_v22 = vadd.f32 %v1587_v14, %v1475_v25  ;;  %v1477_v58 = vadd.f32 %v1476_v28, %v2910_v51  ;;  %v1834_v62 = vmax.f32 %v1586_v16, 0.0 }
 0x1ec   : > { %v1478_v34 = vpop.f32.mrf.mxu0  ;;  %v1591_v35 = vpop.f32.mrf.mxu1 }
 0x1ed   : > { %v1835_v38 = vmax.f32 %v1588_v22, 0.0  ;;  %v1590_v39 = vadd.f32 %v1589_v19, %v1477_v58  ;;  %v1479_v23 = vadd.f32 %v1478_v34, %v2914_v17  ;;  %v3003_v11 = vadd.f32 %v1897_v21, %v1896_v59 }
 0x1ee   : > { %v1482_v8 = vpop.f32.mrf.mxu0  ;;  %v1595_v10 = vpop.f32.mrf.mxu1  ;;  %v1899_v57 = vmul.f32 %v2930_v27, %v1834_v62 }
 0x1ef   : > { %v1900_v54 = vmul.f32 %v2925_v20, %v1835_v38  ;;  %v1592_v55 = vadd.f32 %v1591_v35, %v1479_v23  ;;  %v1483_v56 = vadd.f32 %v1482_v8, %v2910_v51  ;;  %v1837_v24 = vmax.f32 %v1590_v39, 0.0 }
 0x1f0   : > { %v1484_v43 = vpop.f32.mrf.mxu0  ;;  %v1597_v29 = vpop.f32.mrf.mxu1  ;;  %v3030_v8 = vrot.slane %v2920_v63, %v2727_v46 }
 0x1f1   : > { %v1838_v30 = vmax.f32 %v1592_v55, 0.0  ;;  %v1596_v31 = vadd.f32 %v1595_v10, %v1483_v56  ;;  %v1485_v33 = vadd.f32 %v1484_v43, %v2914_v17  ;;  %v3009_v37 = vadd.f32 %v1900_v54, %v1899_v57 }
 0x1f2   : > { %v1486_v1 = vpop.f32.mrf.mxu0  ;;  %v1599_v36 = vpop.f32.mrf.mxu1  ;;  %v1902_v47 = vmul.f32 %v2930_v27, %v1837_v24 }
 0x1f3   : > { %v1903_v41 = vmul.f32 %v2925_v20, %v1838_v30  ;;  %v1598_v42 = vadd.f32 %v1597_v29, %v1485_v33  ;;  %v1487_v44 = vadd.f32 %v1486_v1, %v2910_v51  ;;  %v1840_v48 = vmax.f32 %v1596_v31, 0.0 }
 0x1f4   : > { %v1488_v49 = vpop.f32.mrf.mxu0  ;;  %v1601_v60 = vpop.f32.mrf.mxu1  ;;  %v3020_v51 = vrot.slane %v2906_v50, %v2727_v46 }
 0x1f5   : > { %v1841_v61 = vmax.f32 %v1598_v42, 0.0  ;;  %v1600_v3 = vadd.f32 %v1599_v36, %v1487_v44  ;;  %v1489_v4 = vadd.f32 %v1488_v49, %v2914_v17  ;;  %v3015_v12 = vadd.f32 %v1903_v41, %v1902_v47 }
 0x1f6   : > { %v2245_v6 = vpop.f32.mrf.mxu0  ;;  %v2309_v7 = vpop.f32.mrf.mxu1  ;;  %v1905_v16 = vmul.f32 %v2930_v27, %v1840_v48 }
 0x1f7   : > { %v1906_v13 = vmul.f32 %v2925_v20, %v1841_v61  ;;  %v1843_v14 = vmax.f32 %v1600_v3, 0.0  ;;  %v1602_v15 = vadd.f32 %v1601_v60, %v1489_v4 }
 0x1f8   : > { %v2246_v25 = vpop.f32.mrf.mxu0  ;;  %v2310_v28 = vpop.f32.mrf.mxu1 }
 0x1f9   : > { %v1844_v19 = vmax.f32 %v1602_v15, 0.0  ;;  %v2247_v21 = vadd.f32 %v2246_v25, %v2245_v6  ;;  %v3023_v58 = vadd.f32 %v1906_v13, %v1905_v16  ;;  %v1908_v59 = vmul.f32 %v2930_v27, %v1843_v14 }
 0x1fa   : > { %v2248_v22 = vpop.f32.mrf.mxu0  ;;  %v2312_v17 = vpop.f32.mrf.mxu1  ;;  %v2311_v35 = vadd.f32 %v2310_v28, %v2309_v7 }
 0x1fb   : > { %v1909_v62 = vmul.f32 %v2925_v20, %v1844_v19  ;;  %v1639_v34 = vadd.f32 %v2247_v21, %v3020_v51 }
 0x1fc   : > { %v2249_v38 = vpop.f32.mrf.mxu0  ;;  %v2313_v50 = vpop.f32.mrf.mxu1 }
 0x1fd   : > { %v1736_v39 = vadd.f32 %v2311_v35, %v1639_v34  ;;  %v2250_v23 = vadd.f32 %v2249_v38, %v2248_v22  ;;  %v3032_v10 = vadd.f32 %v1909_v62, %v1908_v59  ;;  %v2314_v57 = vadd.f32 %v2313_v50, %v2312_v17 }
 0x1fe   : > { %v2251_v54 = vpop.f32.mrf.mxu0  ;;  %v2315_v55 = vpop.f32.mrf.mxu1 }
 0x1ff   : > { %v1800_v56 = vmax.f32 %v1736_v39, 0.0  ;;  %v1642_v27 = vadd.f32 %v2250_v23, %v3020_v51 }
 0x200   : > { %v2252_v20 = vpop.f32.mrf.mxu0  ;;  %v2316_v24 = vpop.f32.mrf.mxu1 }
 0x201   : > { %v1739_v43 = vadd.f32 %v2314_v57, %v1642_v27  ;;  %v2253_v29 = vadd.f32 %v2252_v20, %v2251_v54  ;;  %v1865_v30 = vmul.f32 %v3030_v8, %v1800_v56  ;;  %v2317_v63 = vadd.f32 %v2316_v24, %v2315_v55 }
 0x202   : > { %v2254_v31 = vpop.f32.mrf.mxu0  ;;  %v2318_v33 = vpop.f32.mrf.mxu1 }
 0x203   : > { %v1803_v1 = vmax.f32 %v1739_v43, 0.0  ;;  %v1647_v46 = vadd.f32 %v2253_v29, %v3020_v51  ;;  %v1912_v36 = vadd.f32 %v2937_v40, %v1865_v30 }
 0x204   : > { %v2255_v41 = vpop.f32.mrf.mxu0  ;;  %v2319_v42 = vpop.f32.mrf.mxu1 }
 0x205   : > { %v1744_v44 = vadd.f32 %v2317_v63, %v1647_v46  ;;  %v2256_v47 = vadd.f32 %v2255_v41, %v2254_v31  ;;  %1913 = vadd.xlane.f32.xlu0 %v1912_v36  ;;  %v1868_v48 = vmul.f32 %v3030_v8, %v1803_v1  ;;  %v2320_v4 = vadd.f32 %v2319_v42, %v2318_v33 }
 0x206   : > { %v2257_v49 = vpop.f32.mrf.mxu0  ;;  %v2321_v60 = vpop.f32.mrf.mxu1 }
 0x207   : > { %v1806_v61 = vmax.f32 %v1744_v44, 0.0  ;;  %v1650_v3 = vadd.f32 %v2256_v47, %v3020_v51  ;;  %v1916_v6 = vadd.f32 %v2943_v5, %v1868_v48 }
 0x208   : > { %v2258_v7 = vpop.f32.mrf.mxu0  ;;  %v2322_v13 = vpop.f32.mrf.mxu1 }
 0x209   : > { %v1747_v14 = vadd.f32 %v2320_v4, %v1650_v3  ;;  %v2259_v15 = vadd.f32 %v2258_v7, %v2257_v49  ;;  %1917 = vadd.xlane.f32.xlu0 %v1916_v6  ;;  %v1871_v40 = vmul.f32 %v3030_v8, %v1806_v61  ;;  %v2323_v21 = vadd.f32 %v2322_v13, %v2321_v60 }
 0x20a   : > { %v2260_v16 = vpop.f32.mrf.mxu0  ;;  %v2324_v25 = vpop.f32.mrf.mxu1 }
 0x20b   : > { %v1809_v28 = vmax.f32 %v1747_v14, 0.0  ;;  %v1655_v19 = vadd.f32 %v2259_v15, %v3020_v51  ;;  %v1920_v22 = vadd.f32 %v2949_v18, %v1871_v40 }
 0x20c   : > { %v2261_v17 = vpop.f32.mrf.mxu0  ;;  %v2325_v59 = vpop.f32.mrf.mxu1 }
 0x20d   : > { %v1752_v62 = vadd.f32 %v2323_v21, %v1655_v19  ;;  %v2262_v34 = vadd.f32 %v2261_v17, %v2260_v16  ;;  %1921 = vadd.xlane.f32.xlu1 %v1920_v22  ;;  %v1874_v5 = vmul.f32 %v3030_v8, %v1809_v28  ;;  %v2326_v23 = vadd.f32 %v2325_v59, %v2324_v25 }
 0x20e   : > { %v2263_v35 = vpop.f32.mrf.mxu0  ;;  %v2327_v38 = vpop.f32.mrf.mxu1 }
 0x20f   : > { %v1812_v50 = vmax.f32 %v1752_v62, 0.0  ;;  %v1658_v39 = vadd.f32 %v2262_v34, %v3020_v51  ;;  %v1924_v54 = vadd.f32 %v2955_v9, %v1874_v5 }
 0x210   : > { %v2264_v55 = vpop.f32.mrf.mxu0  ;;  %v2328_v56 = vpop.f32.mrf.mxu1 }
 0x211   : > { %v1755_v27 = vadd.f32 %v2326_v23, %v1658_v39  ;;  %v2265_v57 = vadd.f32 %v2264_v55, %v2263_v35  ;;  %1925 = vadd.xlane.f32.xlu1 %v1924_v54  ;;  %v1877_v18 = vmul.f32 %v3030_v8, %v1812_v50  ;;  %v2329_v30 = vadd.f32 %v2328_v56, %v2327_v38 }
 0x212   : > { %v2266_v20 = vpop.f32.mrf.mxu0  ;;  %v2330_v24 = vpop.f32.mrf.mxu1 }
 0x213   : > { %v1815_v43 = vmax.f32 %v1755_v27, 0.0  ;;  %v1663_v29 = vadd.f32 %v2265_v57, %v3020_v51  ;;  %v1928_v31 = vadd.f32 %v2961_v45, %v1877_v18 }
 0x214   : > { %v2267_v33 = vpop.f32.mrf.mxu0  ;;  %v2331_v1 = vpop.f32.mrf.mxu1 }
 0x215   : > { %v1760_v46 = vadd.f32 %v2329_v30, %v1663_v29  ;;  %v2268_v63 = vadd.f32 %v2267_v33, %v2266_v20  ;;  %1929 = vadd.xlane.f32.xlu0 %v1928_v31  ;;  %v1880_v9 = vmul.f32 %v3030_v8, %v1815_v43  ;;  %v2332_v47 = vadd.f32 %v2331_v1, %v2330_v24 }
 0x216   : > { %v2269_v36 = vpop.f32.mrf.mxu0  ;;  %v2333_v41 = vpop.f32.mrf.mxu1 }
 0x217   : > { %v1818_v42 = vmax.f32 %v1760_v46, 0.0  ;;  %v1666_v44 = vadd.f32 %v2268_v63, %v3020_v51  ;;  %v1932_v48 = vadd.f32 %v2967_v0, %v1880_v9 }
 0x218   : > { %v2270_v49 = vpop.f32.mrf.mxu0  ;;  %v2334_v60 = vpop.f32.mrf.mxu1 }
 0x219   : > { %v1763_v61 = vadd.f32 %v2332_v47, %v1666_v44  ;;  %v2271_v3 = vadd.f32 %v2270_v49, %v2269_v36  ;;  %1933 = vadd.xlane.f32.xlu1 %v1932_v48  ;;  %v1883_v45 = vmul.f32 %v3030_v8, %v1818_v42  ;;  %v2335_v14 = vadd.f32 %v2334_v60, %v2333_v41 }
 0x21a   : > { %v2272_v4 = vpop.f32.mrf.mxu0  ;;  %v2336_v6 = vpop.f32.mrf.mxu1 }
 0x21b   : > { %v1821_v7 = vmax.f32 %v1763_v61, 0.0  ;;  %v1671_v13 = vadd.f32 %v2271_v3, %v3020_v51  ;;  %v1936_v15 = vadd.f32 %v2973_v52, %v1883_v45 }
 0x21c   : > { %v2273_v40 = vpop.f32.mrf.mxu0  ;;  %v2337_v16 = vpop.f32.mrf.mxu1 }
 0x21d   : > { %v1768_v25 = vadd.f32 %v2335_v14, %v1671_v13  ;;  %v2274_v28 = vadd.f32 %v2273_v40, %v2272_v4  ;;  %1937 = vadd.xlane.f32.xlu0 %v1936_v15  ;;  %v1886_v0 = vmul.f32 %v3030_v8, %v1821_v7  ;;  %v2338_v59 = vadd.f32 %v2337_v16, %v2336_v6 }
 0x21e   : > { %v2275_v19 = vpop.f32.mrf.mxu0  ;;  %v2339_v21 = vpop.f32.mrf.mxu1 }
 0x21f   : > { %v1824_v22 = vmax.f32 %v1768_v25, 0.0  ;;  %v1674_v17 = vadd.f32 %v2274_v28, %v3020_v51  ;;  %v1940_v62 = vadd.f32 %v2979_v26, %v1886_v0 }
 0x220   : > { %v2276_v34 = vpop.f32.mrf.mxu0  ;;  %v2340_v5 = vpop.f32.mrf.mxu1 }
 0x221   : > { %v1771_v35 = vadd.f32 %v2338_v59, %v1674_v17  ;;  %v2277_v38 = vadd.f32 %v2276_v34, %v2275_v19  ;;  %1941 = vadd.xlane.f32.xlu1 %v1940_v62  ;;  %v1889_v52 = vmul.f32 %v3030_v8, %v1824_v22  ;;  %v2341_v55 = vadd.f32 %v2340_v5, %v2339_v21 }
 0x222   : > { %v2278_v50 = vpop.f32.mrf.mxu0  ;;  %v2342_v39 = vpop.f32.mrf.mxu1 }
 0x223   : > { %v1827_v23 = vmax.f32 %v1771_v35, 0.0  ;;  %v1679_v54 = vadd.f32 %v2277_v38, %v3020_v51  ;;  %v1944_v56 = vadd.f32 %v2985_v32, %v1889_v52 }
 0x224   : > { %v2279_v27 = vpop.f32.mrf.mxu0  ;;  %v2343_v57 = vpop.f32.mrf.mxu1 }
 0x225   : > { %v1776_v18 = vadd.f32 %v2341_v55, %v1679_v54  ;;  %v2280_v20 = vadd.f32 %v2279_v27, %v2278_v50  ;;  %1945 = vadd.xlane.f32.xlu0 %v1944_v56  ;;  %v1892_v26 = vmul.f32 %v3030_v8, %v1827_v23  ;;  %v2344_v31 = vadd.f32 %v2343_v57, %v2342_v39  ;;  %v3081_v27 = vld [vmem:[#allocation2] ss:$0 sm:$0xff] }
 0x226   : > { %v2281_v24 = vpop.f32.mrf.mxu0  ;;  %v2345_v43 = vpop.f32.mrf.mxu1 }
 0x227   : > { %v1830_v29 = vmax.f32 %v1776_v18, 0.0  ;;  %v1682_v30 = vadd.f32 %v2280_v20, %v3020_v51  ;;  %v1948_v33 = vadd.f32 %v2991_v2, %v1892_v26 }
 0x228   : > { %v2282_v1 = vpop.f32.mrf.mxu0  ;;  %v2346_v46 = vpop.f32.mrf.mxu1 }
 0x229   : > { %v1779_v63 = vadd.f32 %v2344_v31, %v1682_v30  ;;  %v2283_v9 = vadd.f32 %v2282_v1, %v2281_v24  ;;  %1949 = vadd.xlane.f32.xlu1 %v1948_v33  ;;  %v1895_v32 = vmul.f32 %v3030_v8, %v1830_v29  ;;  %v2347_v47 = vadd.f32 %v2346_v46, %v2345_v43 }
 0x22a   : > { %v2284_v36 = vpop.f32.mrf.mxu0  ;;  %v2348_v41 = vpop.f32.mrf.mxu1 }
 0x22b   : > { %v1833_v42 = vmax.f32 %v1779_v63, 0.0  ;;  %v1687_v44 = vadd.f32 %v2283_v9, %v3020_v51  ;;  %v1952_v48 = vadd.f32 %v2997_v53, %v1895_v32 }
 0x22c   : > { %v2285_v49 = vpop.f32.mrf.mxu0  ;;  %v2349_v60 = vpop.f32.mrf.mxu1 }
 0x22d   : > { %v1784_v61 = vadd.f32 %v2347_v47, %v1687_v44  ;;  %v2286_v3 = vadd.f32 %v2285_v49, %v2284_v36  ;;  %1953 = vadd.xlane.f32.xlu0 %v1952_v48  ;;  %v1898_v2 = vmul.f32 %v3030_v8, %v1833_v42  ;;  %v2350_v13 = vadd.f32 %v2349_v60, %v2348_v41 }
 0x22e   : > { %v2287_v45 = vpop.f32.mrf.mxu0  ;;  %v2351_v4 = vpop.f32.mrf.mxu1 }
 0x22f   : > { %v1836_v6 = vmax.f32 %v1784_v61, 0.0  ;;  %v1690_v7 = vadd.f32 %v2286_v3, %v3020_v51  ;;  %v1956_v14 = vadd.f32 %v3003_v11, %v1898_v2 }
 0x230   : > { %v2288_v15 = vpop.f32.mrf.mxu0  ;;  %v2352_v40 = vpop.f32.mrf.mxu1 }
 0x231   : > { %v1787_v16 = vadd.f32 %v2350_v13, %v1690_v7  ;;  %v2289_v25 = vadd.f32 %v2288_v15, %v2287_v45  ;;  %1957 = vadd.xlane.f32.xlu1 %v1956_v14  ;;  %v1901_v53 = vmul.f32 %v3030_v8, %v1836_v6  ;;  %v2353_v22 = vadd.f32 %v2352_v40, %v2351_v4 }
 0x232   : > { %v2290_v28 = vpop.f32.mrf.mxu0  ;;  %v2354_v0 = vpop.f32.mrf.mxu1 }
 0x233   : > { %v1839_v19 = vmax.f32 %v1787_v16, 0.0  ;;  %v1695_v21 = vadd.f32 %v2289_v25, %v3020_v51  ;;  %v1960_v17 = vadd.f32 %v3009_v37, %v1901_v53 }
 0x234   : > { %v2291_v59 = vpop.f32.mrf.mxu0  ;;  %v2355_v62 = vpop.f32.mrf.mxu1 }
 0x235   : > { %v1792_v34 = vadd.f32 %v2353_v22, %v1695_v21  ;;  %v2292_v5 = vadd.f32 %v2291_v59, %v2290_v28  ;;  %1961 = vadd.xlane.f32.xlu0 %v1960_v17  ;;  %v1904_v11 = vmul.f32 %v3030_v8, %v1839_v19  ;;  %v2356_v52 = vadd.f32 %v2355_v62, %v2354_v0 }
 0x237   : > { %v1842_v35 = vmax.f32 %v1792_v34, 0.0  ;;  %v1698_v38 = vadd.f32 %v2292_v5, %v3020_v51  ;;  %v1964_v50 = vadd.f32 %v3015_v12, %v1904_v11 }
 0x239   : > { %v1795_v39 = vadd.f32 %v2356_v52, %v1698_v38  ;;  %1965 = vadd.xlane.f32.xlu1 %v1964_v50  ;;  %v1907_v23 = vmul.f32 %v3030_v8, %v1842_v35 }
 0x23b   : > { %v1845_v54 = vmax.f32 %v1795_v39, 0.0  ;;  %v1968_v37 = vadd.f32 %v3023_v58, %v1907_v23 }
 0x23d   : > { %1969 = vadd.xlane.f32.xlu0 %v1968_v37  ;;  %v1910_v55 = vmul.f32 %v3030_v8, %v1845_v54 }
 0x23f   : > { %v1972_v56 = vadd.f32 %v3032_v10, %v1910_v55 }
 0x241   : > { %1973 = vadd.xlane.f32.xlu1 %v1972_v56 }
 0x28e   : > { %v1914_v51 = vpop.xlane.xlu0 %1913 }
 0x28f   : > { %v1982_v57 = vadd.f32 %v3081_v27, %v1914_v51 }
 0x291   : > { %2512 = vtanh.f32 %v1982_v57 }
 0x292   : > { %v1918_v12 = vpop.xlane.xlu0 %1917 }
 0x293   : > { %v1983_v18 = vadd.f32 %v3081_v27, %v1918_v12 }
 0x295   : > { %2514 = vtanh.f32 %v1983_v18 }
 0x296   : > { %v1922_v20 = vpop.xlane.xlu1 %1921 }
 0x297   : > { %v1984_v58 = vadd.f32 %v3081_v27, %v1922_v20 }
 0x299   : > { %2516 = vtanh.f32 %v1984_v58 }
 0x29a   : > { %v1926_v26 = vpop.xlane.xlu1 %1925 }
 0x29b   : > { %v1985_v8 = vadd.f32 %v3081_v27, %v1926_v26 }
 0x29d   : > { %2518 = vtanh.f32 %v1985_v8 }
 0x29e   : > { %v2513_v10 = vpop.eup %2512  ;;  %v1930_v24 = vpop.xlane.xlu0 %1929 }
 0x29f   : > { %2015 = vst.msk [vmem:[%s3092_s6] sm:$0xff] %vm2014_vm3, %v2513_v10  ;;  %v1986_v43 = vadd.f32 %v3081_v27, %v1930_v24 }
 0x2a1   : > { %2520 = vtanh.f32 %v1986_v43 }
 0x2a2   : > { %v2515_v29 = vpop.eup %2514  ;;  %v1934_v30 = vpop.xlane.xlu1 %1933 }
 0x2a3   : > { %2016 = vst.msk [vmem:[%s3092_s6 + $0x8] sm:$0xff] %vm2014_vm3, %v2515_v29  ;;  %v1987_v31 = vadd.f32 %v3081_v27, %v1934_v30 }
 0x2a5   : > { %2522 = vtanh.f32 %v1987_v31 }
 0x2a6   : > { %v2517_v33 = vpop.eup %2516  ;;  %v1938_v1 = vpop.xlane.xlu0 %1937 }
 0x2a7   : > { %2017 = vst.msk [vmem:[%s3092_s6 + $0x10] sm:$0xff] %vm2014_vm3, %v2517_v33  ;;  %v1988_v46 = vadd.f32 %v3081_v27, %v1938_v1 }
 0x2a9   : > { %2524 = vtanh.f32 %v1988_v46 }
 0x2aa   : > { %v2519_v63 = vpop.eup %2518  ;;  %v1942_v9 = vpop.xlane.xlu1 %1941 }
 0x2ab   : > { %2018 = vst.msk [vmem:[%s3092_s6 + $0x18] sm:$0xff] %vm2014_vm3, %v2519_v63  ;;  %v1989_v32 = vadd.f32 %v3081_v27, %v1942_v9 }
 0x2ad   : > { %2526 = vtanh.f32 %v1989_v32 }
 0x2ae   : > { %v2521_v36 = vpop.eup %2520  ;;  %v1946_v41 = vpop.xlane.xlu0 %1945 }
 0x2af   : > { %2019 = vst.msk [vmem:[%s3092_s6 + $0x20] sm:$0xff] %vm2014_vm3, %v2521_v36  ;;  %v1990_v42 = vadd.f32 %v3081_v27, %v1946_v41 }
 0x2b1   : > { %2528 = vtanh.f32 %v1990_v42 }
 0x2b2   : > { %v2523_v44 = vpop.eup %2522  ;;  %v1950_v47 = vpop.xlane.xlu1 %1949 }
 0x2b3   : > { %2020 = vst.msk [vmem:[%s3092_s6 + $0x28] sm:$0xff] %vm2014_vm3, %v2523_v44  ;;  %v1991_v48 = vadd.f32 %v3081_v27, %v1950_v47 }
 0x2b5   : > { %2530 = vtanh.f32 %v1991_v48 }
 0x2b6   : > { %v2525_v49 = vpop.eup %2524  ;;  %v1954_v60 = vpop.xlane.xlu0 %1953 }
 0x2b7   : > { %2021 = vst.msk [vmem:[%s3092_s6 + $0x30] sm:$0xff] %vm2014_vm3, %v2525_v49  ;;  %v1992_v61 = vadd.f32 %v3081_v27, %v1954_v60 }
 0x2b9   : > { %2532 = vtanh.f32 %v1992_v61 }
 0x2ba   : > { %v2527_v3 = vpop.eup %2526  ;;  %v1958_v2 = vpop.xlane.xlu1 %1957 }
 0x2bb   : > { %2022 = vst.msk [vmem:[%s3092_s6 + $0x38] sm:$0xff] %vm2014_vm3, %v2527_v3  ;;  %v1993_v45 = vadd.f32 %v3081_v27, %v1958_v2 }
 0x2bd   : > { %2534 = vtanh.f32 %v1993_v45 }
 0x2be   : > { %v2529_v4 = vpop.eup %2528  ;;  %v1962_v6 = vpop.xlane.xlu0 %1961 }
 0x2bf   : > { %2023 = vst.msk [vmem:[%s3092_s6 + $0x40] sm:$0xff] %vm2014_vm3, %v2529_v4  ;;  %v1994_v7 = vadd.f32 %v3081_v27, %v1962_v6 }
 0x2c1   : > { %2536 = vtanh.f32 %v1994_v7 }
 0x2c2   : > { %v2531_v13 = vpop.eup %2530  ;;  %v1966_v14 = vpop.xlane.xlu1 %1965 }
 0x2c3   : > { %2024 = vst.msk [vmem:[%s3092_s6 + $0x48] sm:$0xff] %vm2014_vm3, %v2531_v13  ;;  %v1995_v15 = vadd.f32 %v3081_v27, %v1966_v14 }
 0x2c5   : > { %2538 = vtanh.f32 %v1995_v15 }
 0x2c6   : > { %v2533_v40 = vpop.eup %2532  ;;  %v1970_v16 = vpop.xlane.xlu0 %1969 }
 0x2c7   : > { %2025 = vst.msk [vmem:[%s3092_s6 + $0x50] sm:$0xff] %vm2014_vm3, %v2533_v40  ;;  %v1996_v25 = vadd.f32 %v3081_v27, %v1970_v16 }
 0x2c9   : > { %2540 = vtanh.f32 %v1996_v25 }
 0x2ca   : > { %v2535_v53 = vpop.eup %2534  ;;  %v1974_v28 = vpop.xlane.xlu1 %1973 }
 0x2cb   : > { %2026 = vst.msk [vmem:[%s3092_s6 + $0x58] sm:$0xff] %vm2014_vm3, %v2535_v53  ;;  %v1997_v0 = vadd.f32 %v3081_v27, %v1974_v28 }
 0x2cd   : > { %2542 = vtanh.f32 %v1997_v0 }
 0x2ce   : > { %v2537_v19 = vpop.eup %2536 }
 0x2cf   : > { %2027 = vst.msk [vmem:[%s3092_s6 + $0x60] sm:$0xff] %vm2014_vm3, %v2537_v19 }
 0x2d2   : > { %v2539_v21 = vpop.eup %2538 }
 0x2d3   : > { %2028 = vst.msk [vmem:[%s3092_s6 + $0x68] sm:$0xff] %vm2014_vm3, %v2539_v21 }
 0x2d6   : > { %v2541_v22 = vpop.eup %2540 }
 0x2d7   : > { %2029 = vst.msk [vmem:[%s3092_s6 + $0x70] sm:$0xff] %vm2014_vm3, %v2541_v22 }
 0x2da   : > { %v2543_v17 = vpop.eup %2542 }
 0x2db   : > { %2030 = vst.msk [vmem:[%s3092_s6 + $0x78] sm:$0xff] %vm2014_vm3, %v2543_v17 }
 0x2dc PF: > { %s20_s26 = sadd.s32 1, %s2580_s26  }
 0x2dd   : > { %p17_p1 = scmp.ge.s32.totalorder %s20_s26, 4  }
 0x2df   :  { %19 = sbr.rel (!%p17_p1) target bundleno = 4 (0x4), region = 83 }
 0x2e4   :  { %2053 = vsyncpa [#allocation4], 1 }
 0x2e5   :  { %2055 = vsyncpa [#allocation4 + $0x1], 1 }

</bundles_post_ra>
